<compile_context>
chip_gen: v7x
topology: tpu7x:2x2x1
jax: 0.10.0
libtpu: 0.0.40
codegen_flags: <defaults>
</compile_context>

<pallas_src>
import jax
import jax.numpy as jnp
from jax.experimental import pallas as pl
from jax.experimental.pallas import tpu as pltpu


def mnist_linear_kernel(x_ref, w1_ref, b1_ref, w2_ref, b2_ref, w3_ref, b3_ref, o_ref):
    # Layer 1: Linear(784p -> 512) + ReLU   (bf16 inputs, f32 accumulate, f32 bias)
    h1 = jnp.dot(x_ref[...], w1_ref[...], preferred_element_type=jnp.float32)
    h1 = jnp.maximum(h1 + b1_ref[...], 0.0)
    # Layer 2: Linear(512 -> 512) + ReLU
    h2 = jnp.dot(h1.astype(w2_ref.dtype), w2_ref[...], preferred_element_type=jnp.float32)
    h2 = jnp.maximum(h2 + b2_ref[...], 0.0)
    # Layer 3: Linear(512 -> 128 padded), no activation (logits); padded lanes are zero.
    logits = jnp.dot(h2.astype(w3_ref.dtype), w3_ref[...], preferred_element_type=jnp.float32)
    o_ref[...] = (logits + b3_ref[...]).astype(o_ref.dtype)


def _round_up(n, m):
    return ((n + m - 1) // m) * m


def mnist_linear_forward(x, w1, b1, w2, b2, w3, b3, *, tile_b=256,
                         compute_dtype=jnp.bfloat16):
    B, in_dim = x.shape
    hid = w1.shape[1]
    out_dim = w3.shape[1]

    # ---- lane-dense zero padding of feature dims (zeros cannot leak into results) ----
    in_dim_p = _round_up(in_dim, 128)    # 784 -> 896
    out_dim_p = _round_up(out_dim, 128)  # 10  -> 128
    if in_dim_p != in_dim:
        x = jnp.pad(x, ((0, 0), (0, in_dim_p - in_dim)))
        w1 = jnp.pad(w1, ((0, in_dim_p - in_dim), (0, 0)))
    if out_dim_p != out_dim:
        w3 = jnp.pad(w3, ((0, 0), (0, out_dim_p - out_dim)))
        b3 = jnp.pad(b3, ((0, 0), (0, out_dim_p - out_dim)))

    # ---- batch tiling: big tiles for MXU M-dim, single step for tiny batches ----
    tile_b_eff = _round_up(min(tile_b, _round_up(B, 16)), 16)
    B_pad = _round_up(B, tile_b_eff)
    if B_pad != B:
        x = jnp.pad(x, ((0, B_pad - B), (0, 0)))

    # ---- bf16 weights & activations, f32 accumulation; biases/output stay f32 ----
    x = x.astype(compute_dtype)
    w1 = w1.astype(compute_dtype)
    w2 = w2.astype(compute_dtype)
    w3 = w3.astype(compute_dtype)
    b1 = b1.astype(jnp.float32)
    b2 = b2.astype(jnp.float32)
    b3 = b3.astype(jnp.float32)

    grid = (B_pad // tile_b_eff,)
    resident = lambda i: (0, 0)  # weights/biases: constant block index -> stay resident

    flops = 2 * B_pad * (in_dim_p * hid + hid * hid + hid * out_dim_p)
    bytes_accessed = int(
        x.size * x.dtype.itemsize
        + w1.size * w1.dtype.itemsize
        + w2.size * w2.dtype.itemsize
        + w3.size * w3.dtype.itemsize
        + (b1.size + b2.size + b3.size) * 4
        + B_pad * out_dim_p * 4
    )

    out_padded = pl.pallas_call(
        mnist_linear_kernel,
        out_shape=jax.ShapeDtypeStruct((B_pad, out_dim_p), jnp.float32),
        grid_spec=pltpu.PrefetchScalarGridSpec(
            num_scalar_prefetch=0,
            grid=grid,
            in_specs=[
                pl.BlockSpec((tile_b_eff, in_dim_p), lambda i: (i, 0)),  # x tile
                pl.BlockSpec((in_dim_p, hid), resident),                 # W1 (896, 512)
                pl.BlockSpec((1, hid), resident),                        # b1
                pl.BlockSpec((hid, hid), resident),                      # W2 (512, 512)
                pl.BlockSpec((1, hid), resident),                        # b2
                pl.BlockSpec((hid, out_dim_p), resident),                # W3 (512, 128)
                pl.BlockSpec((1, out_dim_p), resident),                  # b3
            ],
            out_specs=pl.BlockSpec((tile_b_eff, out_dim_p), lambda i: (i, 0)),
        ),
        compiler_params=pltpu.CompilerParams(
            dimension_semantics=("parallel",),
        ),
        cost_estimate=pl.CostEstimate(
            flops=flops, transcendentals=0, bytes_accessed=bytes_accessed
        ),
    )(x, w1, b1, w2, b2, w3, b3)

    # Slice away batch padding and the zero-padded logit lanes.
    return out_padded[:B, :out_dim]


def init_params(key, input_size=784, hidden_size=512, output_size=10, dtype=jnp.float32):
    # Deterministic synthetic init (uniform, PyTorch-like fan_in scaling).
    def linear_init(k, fan_in, fan_out):
        k_w, k_b = jax.random.split(k)
        bound = 1.0 / jnp.sqrt(fan_in)
        # stored transposed: (in, out)
        w = jax.random.uniform(k_w, (fan_in, fan_out), dtype, -bound, bound)
        b = jax.random.uniform(k_b, (1, fan_out), dtype, -bound, bound)
        return w, b

    k1, k2, k3 = jax.random.split(key, 3)
    w1, b1 = linear_init(k1, input_size, hidden_size)
    w2, b2 = linear_init(k2, hidden_size, hidden_size)
    w3, b3 = linear_init(k3, hidden_size, output_size)
    return w1, b1, w2, b2, w3, b3


if __name__ == "__main__":
    key = jax.random.PRNGKey(0)
    k_x, k_p = jax.random.split(key)

    batch = 32
    input_size, hidden_size, output_size = 784, 512, 10

    x = jax.random.normal(k_x, (batch, input_size), jnp.float32)
    w1, b1, w2, b2, w3, b3 = init_params(
        k_p, input_size, hidden_size, output_size, jnp.float32
    )

    logits = mnist_linear_forward(x, w1, b1, w2, b2, w3, b3)
    logits = jax.block_until_ready(logits)
    assert logits.shape == (batch, output_size)

    # Pure-JAX reference using the same bf16-weight / f32-accumulate recipe.
    bf = jnp.bfloat16
    h1 = jnp.maximum(
        jnp.dot(x.astype(bf), w1.astype(bf), preferred_element_type=jnp.float32) + b1, 0.0)
    h2 = jnp.maximum(
        jnp.dot(h1.astype(bf), w2.astype(bf), preferred_element_type=jnp.float32) + b2, 0.0)
    ref = jnp.dot(h2.astype(bf), w3.astype(bf), preferred_element_type=jnp.float32) + b3
    assert jnp.allclose(logits, ref, atol=2e-2, rtol=2e-2), float(
        jnp.max(jnp.abs(logits - ref)))

    # Sanity check against the original all-f32 module forward (loose tol for bf16 weights).
    h1f = jnp.maximum(x @ w1 + b1, 0.0)
    h2f = jnp.maximum(h1f @ w2 + b2, 0.0)
    ref_f32 = h2f @ w3 + b3
    assert jnp.allclose(logits, ref_f32, atol=1e-1, rtol=1e-1)

    print("KERNEL_OK")
</pallas_src>

<mosaic_0001>
module attributes {stable_mosaic.version = 11 : i64} {
  func.func @mnist_linear_kernel(%arg0: i32, %arg1: memref<32x896xbf16, #tpu.memory_space<vmem>>, %arg2: memref<896x512xbf16, #tpu.memory_space<vmem>>, %arg3: memref<1x512xf32, #tpu.memory_space<vmem>>, %arg4: memref<512x512xbf16, #tpu.memory_space<vmem>>, %arg5: memref<1x512xf32, #tpu.memory_space<vmem>>, %arg6: memref<512x128xbf16, #tpu.memory_space<vmem>>, %arg7: memref<1x128xf32, #tpu.memory_space<vmem>>, %arg8: memref<32x128xf32, #tpu.memory_space<vmem>>) attributes {dimension_semantics = [#tpu.dimension_semantics<parallel>], iteration_bounds = array<i64: 1>, scalar_prefetch = 0 : i64, scratch_operands = 0 : i64, tpu.core_type = #tpu.core_type<tc>, window_params = [{transform_indices = @transform_0, window_bounds = array<i64: 32, 896>}, {pipeline_mode = #tpu.pipeline_mode<synchronous>, transform_indices = @transform_1, window_bounds = array<i64: 896, 512>}, {pipeline_mode = #tpu.pipeline_mode<synchronous>, transform_indices = @transform_2, window_bounds = array<i64: 1, 512>}, {pipeline_mode = #tpu.pipeline_mode<synchronous>, transform_indices = @transform_3, window_bounds = array<i64: 512, 512>}, {pipeline_mode = #tpu.pipeline_mode<synchronous>, transform_indices = @transform_4, window_bounds = array<i64: 1, 512>}, {pipeline_mode = #tpu.pipeline_mode<synchronous>, transform_indices = @transform_5, window_bounds = array<i64: 512, 128>}, {pipeline_mode = #tpu.pipeline_mode<synchronous>, transform_indices = @transform_6, window_bounds = array<i64: 1, 128>}, {transform_indices = @transform_7, window_bounds = array<i64: 32, 128>}]} {
    %c0 = arith.constant 0 : index
    %c0_0 = arith.constant 0 : index
    %0 = vector.load %arg1[%c0, %c0_0] : memref<32x896xbf16, #tpu.memory_space<vmem>>, vector<32x896xbf16>
    %c0_1 = arith.constant 0 : index
    %c0_2 = arith.constant 0 : index
    %1 = vector.load %arg2[%c0_1, %c0_2] : memref<896x512xbf16, #tpu.memory_space<vmem>>, vector<896x512xbf16>
    %cst = arith.constant dense<0.000000e+00> : vector<32x512xf32>
    %2 = tpu.matmul %0, %1, %cst {dimension_numbers = #tpu.dot_dimension_numbers<[1], [0], [0], [1], [0, 0, 1, 1], [], []>} : vector<32x896xbf16>, vector<896x512xbf16>, vector<32x512xf32> -> vector<32x512xf32>
    %c0_3 = arith.constant 0 : index
    %c0_4 = arith.constant 0 : index
    %3 = vector.load %arg3[%c0_3, %c0_4] : memref<1x512xf32, #tpu.memory_space<vmem>>, vector<1x512xf32>
    %4 = vector.broadcast %3 : vector<1x512xf32> to vector<32x512xf32>
    %5 = arith.addf %2, %4 : vector<32x512xf32>
    %cst_5 = arith.constant 0.000000e+00 : f32
    %6 = vector.broadcast %cst_5 : f32 to vector<32x512xf32>
    %7 = arith.maximumf %5, %6 : vector<32x512xf32>
    %8 = arith.truncf %7 : vector<32x512xf32> to vector<32x512xbf16>
    %c0_6 = arith.constant 0 : index
    %c0_7 = arith.constant 0 : index
    %9 = vector.load %arg4[%c0_6, %c0_7] : memref<512x512xbf16, #tpu.memory_space<vmem>>, vector<512x512xbf16>
    %cst_8 = arith.constant dense<0.000000e+00> : vector<32x512xf32>
    %10 = tpu.matmul %8, %9, %cst_8 {dimension_numbers = #tpu.dot_dimension_numbers<[1], [0], [0], [1], [0, 0, 1, 1], [], []>} : vector<32x512xbf16>, vector<512x512xbf16>, vector<32x512xf32> -> vector<32x512xf32>
    %c0_9 = arith.constant 0 : index
    %c0_10 = arith.constant 0 : index
    %11 = vector.load %arg5[%c0_9, %c0_10] : memref<1x512xf32, #tpu.memory_space<vmem>>, vector<1x512xf32>
    %12 = vector.broadcast %11 : vector<1x512xf32> to vector<32x512xf32>
    %13 = arith.addf %10, %12 : vector<32x512xf32>
    %cst_11 = arith.constant 0.000000e+00 : f32
    %14 = vector.broadcast %cst_11 : f32 to vector<32x512xf32>
    %15 = arith.maximumf %13, %14 : vector<32x512xf32>
    %16 = arith.truncf %15 : vector<32x512xf32> to vector<32x512xbf16>
    %c0_12 = arith.constant 0 : index
    %c0_13 = arith.constant 0 : index
    %17 = vector.load %arg6[%c0_12, %c0_13] : memref<512x128xbf16, #tpu.memory_space<vmem>>, vector<512x128xbf16>
    %cst_14 = arith.constant dense<0.000000e+00> : vector<32x128xf32>
    %18 = tpu.matmul %16, %17, %cst_14 {dimension_numbers = #tpu.dot_dimension_numbers<[1], [0], [0], [1], [0, 0, 1, 1], [], []>} : vector<32x512xbf16>, vector<512x128xbf16>, vector<32x128xf32> -> vector<32x128xf32>
    %c0_15 = arith.constant 0 : index
    %c0_16 = arith.constant 0 : index
    %19 = vector.load %arg7[%c0_15, %c0_16] : memref<1x128xf32, #tpu.memory_space<vmem>>, vector<1x128xf32>
    %20 = vector.broadcast %19 : vector<1x128xf32> to vector<32x128xf32>
    %21 = arith.addf %18, %20 : vector<32x128xf32>
    %c0_17 = arith.constant 0 : index
    %c0_18 = arith.constant 0 : index
    %22 = vector.load %arg8[%c0_17, %c0_18] : memref<32x128xf32, #tpu.memory_space<vmem>>, vector<32x128xf32>
    tpu.vector_store %arg8[%c0_17, %c0_18], %21 {strides = array<i32>} : memref<32x128xf32, #tpu.memory_space<vmem>>, vector<32x128xf32>,
    return
  }
  func.func @transform_0(%arg0: i32) -> (i32, i32) {
    %c0_i32 = arith.constant 0 : i32
    %c0_i32_0 = arith.constant 0 : i32
    return %arg0, %c0_i32 : i32, i32
  }
  func.func @transform_1(%arg0: i32) -> (i32, i32) {
    %c0_i32 = arith.constant 0 : i32
    %c0_i32_0 = arith.constant 0 : i32
    %c0_i32_1 = arith.constant 0 : i32
    return %c0_i32, %c0_i32_0 : i32, i32
  }
  func.func @transform_2(%arg0: i32) -> (i32, i32) {
    %c0_i32 = arith.constant 0 : i32
    %c0_i32_0 = arith.constant 0 : i32
    %c0_i32_1 = arith.constant 0 : i32
    return %c0_i32, %c0_i32_0 : i32, i32
  }
  func.func @transform_3(%arg0: i32) -> (i32, i32) {
    %c0_i32 = arith.constant 0 : i32
    %c0_i32_0 = arith.constant 0 : i32
    %c0_i32_1 = arith.constant 0 : i32
    return %c0_i32, %c0_i32_0 : i32, i32
  }
  func.func @transform_4(%arg0: i32) -> (i32, i32) {
    %c0_i32 = arith.constant 0 : i32
    %c0_i32_0 = arith.constant 0 : i32
    %c0_i32_1 = arith.constant 0 : i32
    return %c0_i32, %c0_i32_0 : i32, i32
  }
  func.func @transform_5(%arg0: i32) -> (i32, i32) {
    %c0_i32 = arith.constant 0 : i32
    %c0_i32_0 = arith.constant 0 : i32
    %c0_i32_1 = arith.constant 0 : i32
    return %c0_i32, %c0_i32_0 : i32, i32
  }
  func.func @transform_6(%arg0: i32) -> (i32, i32) {
    %c0_i32 = arith.constant 0 : i32
    %c0_i32_0 = arith.constant 0 : i32
    %c0_i32_1 = arith.constant 0 : i32
    return %c0_i32, %c0_i32_0 : i32, i32
  }
  func.func @transform_7(%arg0: i32) -> (i32, i32) {
    %c0_i32 = arith.constant 0 : i32
    %c0_i32_0 = arith.constant 0 : i32
    return %arg0, %c0_i32 : i32, i32
  }
}

</mosaic_0001>

<bundles_post_ra>
// kernel: tpu_custom_call.1
= control target key start
LH: loop header
LB: loop body
LE: loop exit
PB: predicated region body
PF: predicated region fallthrough
CT: control target
= control target key end

     0   :  { %12 = vsyncpa [#allocation3], 0  ;;  %s4828_s0 = inlined_call_operand.hbm [shape: bf16[32,896], index: 0, kind: input, shape index: {}]   ;;  %s4829_s1 = inlined_call_operand.hbm [shape: bf16[896,512], index: 1, kind: input, shape index: {}]   ;;  %s4830_s2 = inlined_call_operand.vmem [shape: f32[1,512], index: 2, kind: input, shape index: {}]   ;;  %s4831_s3 = inlined_call_operand.hbm [shape: bf16[512,512], index: 3, kind: input, shape index: {}]   ;;  %s4832_s4 = inlined_call_operand.vmem [shape: f32[1,512], index: 4, kind: input, shape index: {}]   ;;  %s4833_s5 = inlined_call_operand.hbm [shape: bf16[512,128], index: 5, kind: input, shape index: {}]   ;;  %s4834_s6 = inlined_call_operand.vmem [shape: f32[1,128], index: 6, kind: input, shape index: {}]   ;;  %s4835_s7 = inlined_call_operand.hbm [shape: f32[32,128], index: 7, kind: output, shape index: {}]  }
   0x1   :  { %13 = vsyncpa [#allocation6], 0 }
   0x2   :  { %14 = vsyncpa [#allocation9], 0 }
   0x3   :  { %15 = vsyncpa [#allocation4], 0  ;;  %s4658_s24 = smov [#allocation5]   ;;  %s4540_s28 = scalar_lea.hbm %s4829_s1, 28672 }
   0x4   :  { %s33_s25 = sshll.u32 %s4658_s24, 4  ;;  %p4541_p0 = scmp.ne.s32.totalorder %s4829_s1, %s4540_s28  ;;  %s34_s25 = int_to_ptr.vmem [resolvable:$true] %s33_s25 }
   0x5   :  { %p4544_p1 = scmp.lt.u32.totalorder %s4540_s28, %s4829_s1 }
   0x7   :  { %p4546_p2 = pnand %p4544_p1, %p4541_p0 }
   0x9   :  { %4549 = shalt.err (!%p4546_p2)
}
   0xa   :  { %s4550_s10 = scalar_lea.vmem %s34_s25, 28672  ;;  %p4555_p4 = scmp.lt.s32.totalorder %s34_s25, %s34_s25 }
   0xb   :  { %p4551_p3 = scmp.ne.s32.totalorder %s34_s25, %s4550_s10  ;;  %p4556_p5 = scmp.lt.s32.totalorder %s4550_s10, %s4550_s10 }
   0xd   :  { %p4557_p6 = por %p4556_p5, %p4555_p4 }
   0xf   :  { %p4558_p7 = pnand %p4557_p6, %p4551_p3 }
  0x11   :  { %4561 = shalt.err (!%p4558_p7)
}
  0x12   :  { %s4659_s11 = smov 256   ;;  %s4660_s12 = smov 16  }
  0x13   :  { %39 = dma.hbm_to_vmem [thread:$0]  %s4829_s1, 28672, %s34_s25, [#allocation6], %s4659_s11, %s4659_s11, %s4660_s12  }
  0x14   :  { %s4661_s15 = smov [#allocation2]   ;;  %s4562_s19 = scalar_lea.hbm %s4828_s0, 1792 }
  0x15   :  { %s21_s16 = sshll.u32 %s4661_s15, 4  ;;  %p4563_p8 = scmp.ne.s32.totalorder %s4828_s0, %s4562_s19  ;;  %s22_s16 = int_to_ptr.vmem [resolvable:$true] %s21_s16 }
  0x16   :  { %p4566_p9 = scmp.lt.u32.totalorder %s4562_s19, %s4828_s0 }
  0x18   :  { %p4568_p10 = pnand %p4566_p9, %p4563_p8 }
  0x1a   :  { %4571 = shalt.err (!%p4568_p10)
}
  0x1b   :  { %s4572_s24 = scalar_lea.vmem %s22_s16, 1792  ;;  %p4577_p12 = scmp.lt.s32.totalorder %s22_s16, %s22_s16 }
  0x1c   :  { %p4573_p11 = scmp.ne.s32.totalorder %s22_s16, %s4572_s24  ;;  %p4578_p13 = scmp.lt.s32.totalorder %s4572_s24, %s4572_s24 }
  0x1e   :  { %p4579_p0 = por %p4578_p13, %p4577_p12 }
  0x20   :  { %p4580_p1 = pnand %p4579_p0, %p4573_p11 }
  0x22   :  { %4583 = shalt.err (!%p4580_p1)
}
  0x23   :  { %s4662_s1 = smov 448   ;;  %s4663_s25 = smov 28  }
  0x24   :  { %27 = dma.hbm_to_vmem [thread:$0]  %s4828_s0, 1792, %s22_s16, [#allocation3], %s4662_s1, %s4662_s1, %s4663_s25  }
  0x25   :  { %s4664_s28 = smov [#allocation7]   ;;  %s4665_s30 = smov [#allocation8]  }
  0x26   :  { %s47_s29 = sshll.u32 %s4664_s28, 4  ;;  %s61_s8 = sshll.u32 %s4665_s30, 4  ;;  %s48_s29 = int_to_ptr.vmem [resolvable:$true] %s47_s29  ;;  %s4739_s8 = int_to_ptr.vmem [resolvable:$true] %s61_s8 }
  0x27   :  { %s4584_s13 = scalar_lea.hbm %s4831_s3, 16384 }
  0x28   :  { %p4585_p2 = scmp.ne.s32.totalorder %s4831_s3, %s4584_s13  ;;  %p4588_p3 = scmp.lt.u32.totalorder %s4584_s13, %s4831_s3 }
  0x2a   :  { %p4590_p4 = pnand %p4588_p3, %p4585_p2 }
  0x2c   :  { %4593 = shalt.err (!%p4590_p4)
}
  0x2d   :  { %s4594_s0 = scalar_lea.vmem %s48_s29, 16384  ;;  %p4599_p6 = scmp.lt.s32.totalorder %s48_s29, %s48_s29 }
  0x2e   :  { %p4595_p5 = scmp.ne.s32.totalorder %s48_s29, %s4594_s0  ;;  %p4600_p7 = scmp.lt.s32.totalorder %s4594_s0, %s4594_s0 }
  0x30   :  { %p4601_p8 = por %p4600_p7, %p4599_p6 }
  0x32   :  { %p4602_p9 = pnand %p4601_p8, %p4595_p5 }
  0x34   :  { %4605 = shalt.err (!%p4602_p9)
}
  0x35   :  { %53 = dma.hbm_to_vmem [thread:$0]  %s4831_s3, 16384, %s48_s29, [#allocation6], %s4659_s11, %s4659_s11, %s4660_s12  }
  0x36   :  { %s4606_s22 = scalar_lea.hbm %s4833_s5, 4096 }
  0x37   :  { %p4607_p10 = scmp.ne.s32.totalorder %s4833_s5, %s4606_s22  ;;  %p4610_p11 = scmp.lt.u32.totalorder %s4606_s22, %s4833_s5 }
  0x39   :  { %p4612_p12 = pnand %p4610_p11, %p4607_p10 }
  0x3b   :  { %4615 = shalt.err (!%p4612_p12)
}
  0x3c   :  { %s4616_s26 = scalar_lea.vmem %s4739_s8, 4096  ;;  %p4621_p0 = scmp.lt.s32.totalorder %s4739_s8, %s4739_s8 }
  0x3d   :  { %p4617_p13 = scmp.ne.s32.totalorder %s4739_s8, %s4616_s26  ;;  %p4622_p1 = scmp.lt.s32.totalorder %s4616_s26, %s4616_s26 }
  0x3f   :  { %p4623_p2 = por %p4622_p1, %p4621_p0 }
  0x41   :  { %p4624_p3 = pnand %p4623_p2, %p4617_p13 }
  0x43   :  { %4627 = shalt.err (!%p4624_p3)
}
  0x44   :  { %s4666_s3 = smov 64   ;;  %s4667_s11 = smov 4  }
  0x45   :  { %67 = dma.hbm_to_vmem [thread:$0]  %s4833_s5, 4096, %s4739_s8, [#allocation9], %s4666_s3, %s4666_s3, %s4667_s11  }
  0x46   :  { %4650 = dma.done.wait [#allocation3], 1792  }
  0x47   :  { %4651 = vsyncadd [#allocation3], 4294965504 }
  0x48   :  { %4652 = dma.done.wait [#allocation6], 45056  }
  0x49   :  { %4653 = vsyncadd [#allocation6], 4294922240 }
  0x4a   :  { %4654 = dma.done.wait [#allocation9], 4096  }
  0x4b   :  { %4655 = vsyncadd [#allocation9], 4294963200  ;;  %v3960_v0 = vld [vmem:[#allocation5 + $0x4] ss:$16 sps:$4 sm:$0xff]   ;;  %v3962_v1 = vld [vmem:[#allocation5 + $0xc] ss:$16 sps:$4 sm:$0xff]  }
  0x4c   :  { %1537 = vmatprep.subr.bf16.mxu0 %v3960_v0  ;;  %v3964_v2 = vld [vmem:[#allocation5] ss:$16 sps:$4 sm:$0xff]   ;;  %v3965_v3 = vld [vmem:[#allocation5 + $0x8] ss:$16 sps:$4 sm:$0xff]   ;;  %1749 = vmatprep.subr.bf16.mxu1 %v3962_v1  ;;  %v3966_v4 = vld [vmem:[#allocation5 + $0x24] ss:$16 sps:$4 sm:$0xff]  }
  0x4d   :  { %1538 = vmatpush1.bf16.msra.mxu0 %v3964_v2  ;;  %1750 = vmatpush1.bf16.msra.mxu1 %v3965_v3  ;;  %v3968_v5 = vld [vmem:[#allocation5 + $0x2c] ss:$16 sps:$4 sm:$0xff]   ;;  %v3970_v6 = vld [vmem:[#allocation5 + $0x20] ss:$16 sps:$4 sm:$0xff]   ;;  %v3971_v7 = vld [vmem:[#allocation5 + $0x28] ss:$16 sps:$4 sm:$0xff]  }
  0x4e   :  { %1539 = vmatprep.subr.bf16.mxu0 %v3966_v4  ;;  %1751 = vmatprep.subr.bf16.mxu1 %v3968_v5  ;;  %v3972_v8 = vld [vmem:[#allocation5 + $0x44] ss:$16 sps:$4 sm:$0xff]   ;;  %v3974_v9 = vld [vmem:[#allocation5 + $0x4c] ss:$16 sps:$4 sm:$0xff]   ;;  %v3976_v10 = vld [vmem:[#allocation5 + $0x40] ss:$16 sps:$4 sm:$0xff]  }
  0x4f   :  { %v3977_v11 = vld [vmem:[#allocation5 + $0x48] ss:$16 sps:$4 sm:$0xff]   ;;  %v3978_v12 = vld [vmem:[#allocation5 + $0x64] ss:$16 sps:$4 sm:$0xff]   ;;  %v3980_v13 = vld [vmem:[#allocation5 + $0x6c] ss:$16 sps:$4 sm:$0xff]  }
  0x50   :  { %v3982_v14 = vld [vmem:[#allocation5 + $0x60] ss:$16 sps:$4 sm:$0xff]   ;;  %v3983_v15 = vld [vmem:[#allocation5 + $0x68] ss:$16 sps:$4 sm:$0xff]   ;;  %v3984_v16 = vld [vmem:[#allocation5 + $0x84] ss:$16 sps:$4 sm:$0xff]  }
  0x51   :  { %1540 = vmatpush1.bf16.msra.mxu0 %v3970_v6  ;;  %1752 = vmatpush1.bf16.msra.mxu1 %v3971_v7  ;;  %v3986_v17 = vld [vmem:[#allocation5 + $0x8c] ss:$16 sps:$4 sm:$0xff]   ;;  %v3988_v18 = vld [vmem:[#allocation5 + $0x80] ss:$16 sps:$4 sm:$0xff]   ;;  %v3989_v19 = vld [vmem:[#allocation5 + $0x88] ss:$16 sps:$4 sm:$0xff]  }
  0x52   :  { %1541 = vmatprep.subr.bf16.mxu0 %v3972_v8  ;;  %1753 = vmatprep.subr.bf16.mxu1 %v3974_v9  ;;  %v3990_v20 = vld [vmem:[#allocation5 + $0xa4] ss:$16 sps:$4 sm:$0xff]   ;;  %v3992_v21 = vld [vmem:[#allocation5 + $0xac] ss:$16 sps:$4 sm:$0xff]   ;;  %v3994_v22 = vld [vmem:[#allocation5 + $0xa0] ss:$16 sps:$4 sm:$0xff]  }
  0x53   :  { %v3995_v23 = vld [vmem:[#allocation5 + $0xa8] ss:$16 sps:$4 sm:$0xff]   ;;  %v3996_v24 = vld [vmem:[#allocation5 + $0xc4] ss:$16 sps:$4 sm:$0xff]   ;;  %v3998_v25 = vld [vmem:[#allocation5 + $0xcc] ss:$16 sps:$4 sm:$0xff]  }
  0x54   :  { %v4000_v26 = vld [vmem:[#allocation5 + $0xc0] ss:$16 sps:$4 sm:$0xff]   ;;  %v4001_v27 = vld [vmem:[#allocation5 + $0xc8] ss:$16 sps:$4 sm:$0xff]   ;;  %v4002_v28 = vld [vmem:[#allocation5 + $0xe4] ss:$16 sps:$4 sm:$0xff]  }
  0x55   :  { %1542 = vmatpush1.bf16.msra.mxu0 %v3976_v10  ;;  %1754 = vmatpush1.bf16.msra.mxu1 %v3977_v11  ;;  %v4004_v29 = vld [vmem:[#allocation5 + $0xec] ss:$16 sps:$4 sm:$0xff]   ;;  %v4006_v30 = vld [vmem:[#allocation5 + $0xe0] ss:$16 sps:$4 sm:$0xff]   ;;  %v4007_v31 = vld [vmem:[#allocation5 + $0xe8] ss:$16 sps:$4 sm:$0xff]  }
  0x56   :  { %1543 = vmatprep.subr.bf16.mxu0 %v3978_v12  ;;  %1755 = vmatprep.subr.bf16.mxu1 %v3980_v13  ;;  %v4008_v32 = vld [vmem:[#allocation5 + $0x104] ss:$16 sps:$4 sm:$0xff]   ;;  %v4010_v33 = vld [vmem:[#allocation5 + $0x10c] ss:$16 sps:$4 sm:$0xff]   ;;  %v4012_v34 = vld [vmem:[#allocation5 + $0x100] ss:$16 sps:$4 sm:$0xff]  }
  0x57   :  { %v4013_v35 = vld [vmem:[#allocation5 + $0x108] ss:$16 sps:$4 sm:$0xff]   ;;  %v4014_v36 = vld [vmem:[#allocation5 + $0x124] ss:$16 sps:$4 sm:$0xff]   ;;  %v4016_v37 = vld [vmem:[#allocation5 + $0x12c] ss:$16 sps:$4 sm:$0xff]  }
  0x58   :  { %v4018_v38 = vld [vmem:[#allocation5 + $0x120] ss:$16 sps:$4 sm:$0xff]   ;;  %v4019_v39 = vld [vmem:[#allocation5 + $0x128] ss:$16 sps:$4 sm:$0xff]   ;;  %v4020_v40 = vld [vmem:[#allocation5 + $0x144] ss:$16 sps:$4 sm:$0xff]  }
  0x59   :  { %1544 = vmatpush1.bf16.msra.mxu0 %v3982_v14  ;;  %1756 = vmatpush1.bf16.msra.mxu1 %v3983_v15  ;;  %v4022_v41 = vld [vmem:[#allocation5 + $0x14c] ss:$16 sps:$4 sm:$0xff]   ;;  %v4024_v42 = vld [vmem:[#allocation5 + $0x140] ss:$16 sps:$4 sm:$0xff]   ;;  %v4025_v43 = vld [vmem:[#allocation5 + $0x148] ss:$16 sps:$4 sm:$0xff]  }
  0x5a   :  { %1545 = vmatprep.subr.bf16.mxu0 %v3984_v16  ;;  %1757 = vmatprep.subr.bf16.mxu1 %v3986_v17  ;;  %v4026_v44 = vld [vmem:[#allocation5 + $0x164] ss:$16 sps:$4 sm:$0xff]   ;;  %v4028_v45 = vld [vmem:[#allocation5 + $0x16c] ss:$16 sps:$4 sm:$0xff]   ;;  %v4030_v46 = vld [vmem:[#allocation5 + $0x160] ss:$16 sps:$4 sm:$0xff]  }
  0x5b   :  { %v4031_v47 = vld [vmem:[#allocation5 + $0x168] ss:$16 sps:$4 sm:$0xff]   ;;  %v4058_v48 = vld [vmem:[#allocation2 + $0x4] ss:$28 sps:$4 sm:$0xff]   ;;  %v4034_v50 = vld [vmem:[#allocation5 + $0x18c] ss:$16 sps:$4 sm:$0xff]  }
  0x5c   :  { %v4032_v49 = vld [vmem:[#allocation5 + $0x184] ss:$16 sps:$4 sm:$0xff]   ;;  %1569 = vmatprep.mubr.bf16.mxu0 %v4058_v48  ;;  %1781 = vmatprep.mubr.bf16.mxu1 %v4058_v48  ;;  %v4036_v51 = vld [vmem:[#allocation5 + $0x180] ss:$16 sps:$4 sm:$0xff]   ;;  %v4037_v52 = vld [vmem:[#allocation5 + $0x188] ss:$16 sps:$4 sm:$0xff]  }
  0x5d   :  { %1546 = vmatpush1.bf16.msra.mxu0 %v3988_v18  ;;  %1758 = vmatpush1.bf16.msra.mxu1 %v3989_v19  ;;  %v4038_v53 = vld [vmem:[#allocation5 + $0x1a4] ss:$16 sps:$4 sm:$0xff]   ;;  %v4040_v54 = vld [vmem:[#allocation5 + $0x1ac] ss:$16 sps:$4 sm:$0xff]   ;;  %v4042_v55 = vld [vmem:[#allocation5 + $0x1a0] ss:$16 sps:$4 sm:$0xff]  }
  0x5e   :  { %1547 = vmatprep.subr.bf16.mxu0 %v3990_v20  ;;  %1759 = vmatprep.subr.bf16.mxu1 %v3992_v21  ;;  %v4043_v56 = vld [vmem:[#allocation5 + $0x1a8] ss:$16 sps:$4 sm:$0xff]   ;;  %v4044_v57 = vld [vmem:[#allocation5 + $0x1c4] ss:$16 sps:$4 sm:$0xff]   ;;  %v4046_v58 = vld [vmem:[#allocation5 + $0x1cc] ss:$16 sps:$4 sm:$0xff]  }
  0x5f   :  { %v4048_v59 = vld [vmem:[#allocation5 + $0x1c0] ss:$16 sps:$4 sm:$0xff]   ;;  %v4049_v60 = vld [vmem:[#allocation5 + $0x1c8] ss:$16 sps:$4 sm:$0xff]   ;;  %v4050_v61 = vld [vmem:[#allocation5 + $0x1e4] ss:$16 sps:$4 sm:$0xff]  }
  0x60   :  { %v4052_v62 = vld [vmem:[#allocation5 + $0x1ec] ss:$16 sps:$4 sm:$0xff]   ;;  %v4054_v63 = vld [vmem:[#allocation5 + $0x1e0] ss:$16 sps:$4 sm:$0xff]   ;;  %v4055_v0 = vld [vmem:[#allocation5 + $0x1e8] ss:$16 sps:$4 sm:$0xff]  }
  0x61   :  { %1548 = vmatpush1.bf16.msra.mxu0 %v3994_v22  ;;  %1760 = vmatpush1.bf16.msra.mxu1 %v3995_v23  ;;  %v4061_v1 = vld [vmem:[#allocation5 + $0x204] ss:$16 sps:$4 sm:$0xff]   ;;  %v4064_v2 = vld [vmem:[#allocation5 + $0x20c] ss:$16 sps:$4 sm:$0xff]   ;;  %v4059_v4 = vld [vmem:[#allocation5 + $0x200] ss:$16 sps:$4 sm:$0xff]  }
  0x62   :  { %1549 = vmatprep.subr.bf16.mxu0 %v3996_v24  ;;  %1761 = vmatprep.subr.bf16.mxu1 %v3998_v25  ;;  %v4056_v3 = vld [vmem:[#allocation2] ss:$28 sps:$4 sm:$0xff]   ;;  %v4062_v5 = vld [vmem:[#allocation5 + $0x208] ss:$16 sps:$4 sm:$0xff]   ;;  %v4067_v6 = vld [vmem:[#allocation5 + $0x224] ss:$16 sps:$4 sm:$0xff]  }
  0x63   :  { %v4070_v7 = vld [vmem:[#allocation5 + $0x22c] ss:$16 sps:$4 sm:$0xff]   ;;  %v4065_v8 = vld [vmem:[#allocation5 + $0x220] ss:$16 sps:$4 sm:$0xff]   ;;  %v4068_v9 = vld [vmem:[#allocation5 + $0x228] ss:$16 sps:$4 sm:$0xff]  }
  0x64   :  { %v4073_v10 = vld [vmem:[#allocation5 + $0x244] ss:$16 sps:$4 sm:$0xff]   ;;  %v4076_v11 = vld [vmem:[#allocation5 + $0x24c] ss:$16 sps:$4 sm:$0xff]   ;;  %v4071_v12 = vld [vmem:[#allocation5 + $0x240] ss:$16 sps:$4 sm:$0xff]  }
  0x65   :  { %1550 = vmatpush1.bf16.msra.mxu0 %v4000_v26  ;;  %1762 = vmatpush1.bf16.msra.mxu1 %v4001_v27  ;;  %v4074_v13 = vld [vmem:[#allocation5 + $0x248] ss:$16 sps:$4 sm:$0xff]   ;;  %v4079_v14 = vld [vmem:[#allocation5 + $0x264] ss:$16 sps:$4 sm:$0xff]   ;;  %v4082_v15 = vld [vmem:[#allocation5 + $0x26c] ss:$16 sps:$4 sm:$0xff]  }
  0x66   :  { %1551 = vmatprep.subr.bf16.mxu0 %v4002_v28  ;;  %1763 = vmatprep.subr.bf16.mxu1 %v4004_v29  ;;  %v4077_v16 = vld [vmem:[#allocation5 + $0x260] ss:$16 sps:$4 sm:$0xff]   ;;  %v4080_v17 = vld [vmem:[#allocation5 + $0x268] ss:$16 sps:$4 sm:$0xff]   ;;  %v4085_v18 = vld [vmem:[#allocation5 + $0x284] ss:$16 sps:$4 sm:$0xff]  }
  0x67   :  { %v4088_v19 = vld [vmem:[#allocation5 + $0x28c] ss:$16 sps:$4 sm:$0xff]   ;;  %v4083_v20 = vld [vmem:[#allocation5 + $0x280] ss:$16 sps:$4 sm:$0xff]   ;;  %v4086_v21 = vld [vmem:[#allocation5 + $0x288] ss:$16 sps:$4 sm:$0xff]  }
  0x68   :  { %v4091_v22 = vld [vmem:[#allocation5 + $0x2a4] ss:$16 sps:$4 sm:$0xff]   ;;  %v4094_v23 = vld [vmem:[#allocation5 + $0x2ac] ss:$16 sps:$4 sm:$0xff]   ;;  %v4089_v25 = vld [vmem:[#allocation5 + $0x2a0] ss:$16 sps:$4 sm:$0xff]  }
  0x69   :  { %1552 = vmatpush1.bf16.msra.mxu0 %v4006_v30  ;;  %1764 = vmatpush1.bf16.msra.mxu1 %v4007_v31  ;;  %v4143_v24 = vld [vmem:[#allocation2 + $0x3c] ss:$28 sps:$4 sm:$0xff]   ;;  %v4097_v27 = vld [vmem:[#allocation5 + $0x2c4] ss:$16 sps:$4 sm:$0xff]   ;;  %v4095_v30 = vld [vmem:[#allocation5 + $0x2c0] ss:$16 sps:$4 sm:$0xff]  }
  0x6a   :  { %1553 = vmatprep.subr.bf16.mxu0 %v4008_v32  ;;  %1765 = vmatprep.subr.bf16.mxu1 %v4010_v33  ;;  %v4092_v26 = vld [vmem:[#allocation5 + $0x2a8] ss:$16 sps:$4 sm:$0xff]   ;;  %v4100_v28 = vld [vmem:[#allocation5 + $0x2cc] ss:$16 sps:$4 sm:$0xff]   ;;  %v4103_v32 = vld [vmem:[#allocation5 + $0x2e4] ss:$16 sps:$4 sm:$0xff]  }
  0x6b   :  { %v4151_v29 = vld [vmem:[#allocation2 + $0x38] ss:$28 sps:$4 sm:$0xff]   ;;  %v4106_v33 = vld [vmem:[#allocation5 + $0x2ec] ss:$16 sps:$4 sm:$0xff]  }
  0x6c   :  { %v4098_v31 = vld [vmem:[#allocation5 + $0x2c8] ss:$16 sps:$4 sm:$0xff]  }
  0x6d   :  { %1554 = vmatpush1.bf16.msra.mxu0 %v4012_v34  ;;  %1766 = vmatpush1.bf16.msra.mxu1 %v4013_v35  ;;  %v4160_v34 = vld [vmem:[#allocation2 + $0xc] ss:$28 sps:$4 sm:$0xff]   ;;  %v4101_v35 = vld [vmem:[#allocation5 + $0x2e0] ss:$16 sps:$4 sm:$0xff]  }
  0x6e   :  { %1555 = vmatprep.subr.bf16.mxu0 %v4014_v36  ;;  %1767 = vmatprep.subr.bf16.mxu1 %v4016_v37  ;;  %v4104_v36 = vld [vmem:[#allocation5 + $0x2e8] ss:$16 sps:$4 sm:$0xff]   ;;  %v4109_v37 = vld [vmem:[#allocation5 + $0x304] ss:$16 sps:$4 sm:$0xff]  }
  0x6f   :  { %v4122_v48 = vld [vmem:[#allocation5 + $0x348] ss:$16 sps:$4 sm:$0xff]  }
  0x71   :  { %1556 = vmatpush1.bf16.msra.mxu0 %v4018_v38  ;;  %1768 = vmatpush1.bf16.msra.mxu1 %v4019_v39  ;;  %v4112_v38 = vld [vmem:[#allocation5 + $0x30c] ss:$16 sps:$4 sm:$0xff]   ;;  %v4107_v39 = vld [vmem:[#allocation5 + $0x300] ss:$16 sps:$4 sm:$0xff]  }
  0x72   :  { %1557 = vmatprep.subr.bf16.mxu0 %v4020_v40  ;;  %1769 = vmatprep.subr.bf16.mxu1 %v4022_v41  ;;  %v4110_v40 = vld [vmem:[#allocation5 + $0x308] ss:$16 sps:$4 sm:$0xff]   ;;  %v4115_v41 = vld [vmem:[#allocation5 + $0x324] ss:$16 sps:$4 sm:$0xff]  }
  0x75   :  { %1558 = vmatpush1.bf16.msra.mxu0 %v4024_v42  ;;  %1770 = vmatpush1.bf16.msra.mxu1 %v4025_v43  ;;  %v4118_v42 = vld [vmem:[#allocation5 + $0x32c] ss:$16 sps:$4 sm:$0xff]   ;;  %v4113_v43 = vld [vmem:[#allocation5 + $0x320] ss:$16 sps:$4 sm:$0xff]  }
  0x76   :  { %1559 = vmatprep.subr.bf16.mxu0 %v4026_v44  ;;  %1771 = vmatprep.subr.bf16.mxu1 %v4028_v45  ;;  %v4116_v44 = vld [vmem:[#allocation5 + $0x328] ss:$16 sps:$4 sm:$0xff]   ;;  %v4121_v45 = vld [vmem:[#allocation5 + $0x344] ss:$16 sps:$4 sm:$0xff]  }
  0x79   :  { %1560 = vmatpush1.bf16.msra.mxu0 %v4030_v46  ;;  %1772 = vmatpush1.bf16.msra.mxu1 %v4031_v47  ;;  %v4124_v46 = vld [vmem:[#allocation5 + $0x34c] ss:$16 sps:$4 sm:$0xff]   ;;  %v4119_v47 = vld [vmem:[#allocation5 + $0x340] ss:$16 sps:$4 sm:$0xff]  }
  0x7a   :  { %1561 = vmatprep.subr.bf16.mxu0 %v4032_v49  ;;  %1773 = vmatprep.subr.bf16.mxu1 %v4034_v50  ;;  %v4127_v49 = vld [vmem:[#allocation5 + $0x364] ss:$16 sps:$4 sm:$0xff]   ;;  %v4130_v50 = vld [vmem:[#allocation5 + $0x36c] ss:$16 sps:$4 sm:$0xff]  }
  0x7d   :  { %1562 = vmatpush1.bf16.msra.mxu0 %v4036_v51  ;;  %1774 = vmatpush1.bf16.msra.mxu1 %v4037_v52  ;;  %v4125_v51 = vld [vmem:[#allocation5 + $0x360] ss:$16 sps:$4 sm:$0xff]   ;;  %v4128_v52 = vld [vmem:[#allocation5 + $0x368] ss:$16 sps:$4 sm:$0xff]  }
  0x7e   :  { %1563 = vmatprep.subr.bf16.mxu0 %v4038_v53  ;;  %1775 = vmatprep.subr.bf16.mxu1 %v4040_v54  ;;  %v4133_v53 = vld [vmem:[#allocation5 + $0x384] ss:$16 sps:$4 sm:$0xff]   ;;  %v4136_v54 = vld [vmem:[#allocation5 + $0x38c] ss:$16 sps:$4 sm:$0xff]  }
  0x81   :  { %1564 = vmatpush1.bf16.msra.mxu0 %v4042_v55  ;;  %1776 = vmatpush1.bf16.msra.mxu1 %v4043_v56  ;;  %v4131_v55 = vld [vmem:[#allocation5 + $0x380] ss:$16 sps:$4 sm:$0xff]   ;;  %v4134_v56 = vld [vmem:[#allocation5 + $0x388] ss:$16 sps:$4 sm:$0xff]  }
  0x82   :  { %1565 = vmatprep.subr.bf16.mxu0 %v4044_v57  ;;  %1777 = vmatprep.subr.bf16.mxu1 %v4046_v58  ;;  %v4139_v57 = vld [vmem:[#allocation5 + $0x3a4] ss:$16 sps:$4 sm:$0xff]   ;;  %v4142_v58 = vld [vmem:[#allocation5 + $0x3ac] ss:$16 sps:$4 sm:$0xff]  }
  0x85   :  { %1566 = vmatpush1.bf16.msra.mxu0 %v4048_v59  ;;  %1778 = vmatpush1.bf16.msra.mxu1 %v4049_v60  ;;  %v4137_v59 = vld [vmem:[#allocation5 + $0x3a0] ss:$16 sps:$4 sm:$0xff]   ;;  %v4140_v60 = vld [vmem:[#allocation5 + $0x3a8] ss:$16 sps:$4 sm:$0xff]  }
  0x86   :  { %1567 = vmatprep.subr.bf16.mxu0 %v4050_v61  ;;  %1779 = vmatprep.subr.bf16.mxu1 %v4052_v62  ;;  %v4147_v61 = vld [vmem:[#allocation5 + $0x3c4] ss:$16 sps:$4 sm:$0xff]   ;;  %v4150_v62 = vld [vmem:[#allocation5 + $0x3cc] ss:$16 sps:$4 sm:$0xff]  }
  0x89   :  { %1568 = vmatpush1.bf16.msra.mxu0 %v4054_v63  ;;  %1780 = vmatpush1.bf16.msra.mxu1 %v4055_v0  ;;  %v4145_v63 = vld [vmem:[#allocation5 + $0x3c0] ss:$16 sps:$4 sm:$0xff]   ;;  %v4148_v0 = vld [vmem:[#allocation5 + $0x3c8] ss:$16 sps:$4 sm:$0xff]  }
  0x8a   :  { %1590 = vmatprep.subr.bf16.mxu0 %v4061_v1  ;;  %1802 = vmatprep.subr.bf16.mxu1 %v4064_v2  ;;  %v4154_v1 = vld [vmem:[#allocation5 + $0x3e4] ss:$16 sps:$4 sm:$0xff]   ;;  %v4157_v2 = vld [vmem:[#allocation5 + $0x3ec] ss:$16 sps:$4 sm:$0xff]  }
  0x8c   :  { %1570 = vmatmul.mubr.bf16.vlgmr.msra.gmra.mrb[0].mxu0 %v4056_v3  ;;  %1782 = vmatmul.mubr.bf16.vlgmr.msra.gmra.mrb[0].mxu1 %v4056_v3  ;;  %v4152_v3 = vld [vmem:[#allocation5 + $0x3e0] ss:$16 sps:$4 sm:$0xff]  }
  0x8d   :  { %1591 = vmatpush1.bf16.msra.mxu0 %v4059_v4  ;;  %1803 = vmatpush1.bf16.msra.mxu1 %v4062_v5  ;;  %v4155_v4 = vld [vmem:[#allocation5 + $0x3e8] ss:$16 sps:$4 sm:$0xff]   ;;  %v4163_v5 = vld [vmem:[#allocation5 + $0x404] ss:$16 sps:$4 sm:$0xff]  }
  0x8e   :  { %1592 = vmatprep.subr.bf16.mxu0 %v4067_v6  ;;  %1804 = vmatprep.subr.bf16.mxu1 %v4070_v7  ;;  %v4166_v6 = vld [vmem:[#allocation5 + $0x40c] ss:$16 sps:$4 sm:$0xff]   ;;  %v4158_v7 = vld [vmem:[#allocation2 + $0x8] ss:$28 sps:$4 sm:$0xff]  }
  0x8f   :  { %1579 = vmatprep.mubr.bf16.mxu0 %v4143_v24  ;;  %1791 = vmatprep.mubr.bf16.mxu1 %v4143_v24  ;;  %v4182_v24 = vld [vmem:[#allocation5 + $0x468] ss:$16 sps:$4 sm:$0xff]  }
  0x91   :  { %1593 = vmatpush1.bf16.msra.mxu0 %v4065_v8  ;;  %1805 = vmatpush1.bf16.msra.mxu1 %v4068_v9  ;;  %v4161_v8 = vld [vmem:[#allocation5 + $0x400] ss:$16 sps:$4 sm:$0xff]   ;;  %v4164_v9 = vld [vmem:[#allocation5 + $0x408] ss:$16 sps:$4 sm:$0xff]  }
  0x92   :  { %1594 = vmatprep.subr.bf16.mxu0 %v4073_v10  ;;  %1806 = vmatprep.subr.bf16.mxu1 %v4076_v11  ;;  %v4169_v10 = vld [vmem:[#allocation5 + $0x424] ss:$16 sps:$4 sm:$0xff]   ;;  %v4172_v11 = vld [vmem:[#allocation5 + $0x42c] ss:$16 sps:$4 sm:$0xff]  }
  0x94   :  { %1580 = vmatmul.mubr.bf16.gmra.mrb[4].mxu0 %v4151_v29  ;;  %1792 = vmatmul.mubr.bf16.gmra.mrb[4].mxu1 %v4151_v29  ;;  %v4193_v29 = vld [vmem:[#allocation5 + $0x4a4] ss:$16 sps:$4 sm:$0xff]  }
  0x95   :  { %1595 = vmatpush1.bf16.msra.mxu0 %v4071_v12  ;;  %1807 = vmatpush1.bf16.msra.mxu1 %v4074_v13  ;;  %v4245_v12 = vld [vmem:[#allocation2 + $0x44] ss:$28 sps:$4 sm:$0xff]  }
  0x96   :  { %1596 = vmatprep.subr.bf16.mxu0 %v4079_v14  ;;  %1808 = vmatprep.subr.bf16.mxu1 %v4082_v15  ;;  %v4167_v13 = vld [vmem:[#allocation5 + $0x420] ss:$16 sps:$4 sm:$0xff]   ;;  %v4170_v14 = vld [vmem:[#allocation5 + $0x428] ss:$16 sps:$4 sm:$0xff]   ;;  %v4175_v15 = vld [vmem:[#allocation5 + $0x444] ss:$16 sps:$4 sm:$0xff]  }
  0x97   :  { %1622 = vmatprep.mubr.bf16.mxu0 %v4160_v34  ;;  %1834 = vmatprep.mubr.bf16.mxu1 %v4160_v34  ;;  %v4202_v34 = vld [vmem:[#allocation5 + $0x4cc] ss:$16 sps:$4 sm:$0xff]  }
  0x99   :  { %1597 = vmatpush1.bf16.msra.mxu0 %v4077_v16  ;;  %1809 = vmatpush1.bf16.msra.mxu1 %v4080_v17  ;;  %v4178_v16 = vld [vmem:[#allocation5 + $0x44c] ss:$16 sps:$4 sm:$0xff]   ;;  %v4173_v17 = vld [vmem:[#allocation5 + $0x440] ss:$16 sps:$4 sm:$0xff]  }
  0x9a   :  { %1598 = vmatprep.subr.bf16.mxu0 %v4085_v18  ;;  %1810 = vmatprep.subr.bf16.mxu1 %v4088_v19  ;;  %v4176_v18 = vld [vmem:[#allocation5 + $0x448] ss:$16 sps:$4 sm:$0xff]   ;;  %v4253_v19 = vld [vmem:[#allocation2 + $0x40] ss:$28 sps:$4 sm:$0xff]  }
  0x9d   :  { %1599 = vmatpush1.bf16.msra.mxu0 %v4083_v20  ;;  %1811 = vmatpush1.bf16.msra.mxu1 %v4086_v21  ;;  %v4181_v20 = vld [vmem:[#allocation5 + $0x464] ss:$16 sps:$4 sm:$0xff]   ;;  %v4184_v21 = vld [vmem:[#allocation5 + $0x46c] ss:$16 sps:$4 sm:$0xff]  }
  0x9e   :  { %1600 = vmatprep.subr.bf16.mxu0 %v4091_v22  ;;  %1812 = vmatprep.subr.bf16.mxu1 %v4094_v23  ;;  %v4262_v22 = vld [vmem:[#allocation2 + $0x14] ss:$28 sps:$4 sm:$0xff]  }
  0x9f   :  { %v4179_v23 = vld [vmem:[#allocation5 + $0x460] ss:$16 sps:$4 sm:$0xff]  }
  0xa1   :  { %1601 = vmatpush1.bf16.msra.mxu0 %v4089_v25  ;;  %1813 = vmatpush1.bf16.msra.mxu1 %v4092_v26  ;;  %v4187_v25 = vld [vmem:[#allocation5 + $0x484] ss:$16 sps:$4 sm:$0xff]   ;;  %v4190_v26 = vld [vmem:[#allocation5 + $0x48c] ss:$16 sps:$4 sm:$0xff]  }
  0xa2   :  { %1602 = vmatprep.subr.bf16.mxu0 %v4097_v27  ;;  %1814 = vmatprep.subr.bf16.mxu1 %v4100_v28  ;;  %v4185_v27 = vld [vmem:[#allocation5 + $0x480] ss:$16 sps:$4 sm:$0xff]   ;;  %v4188_v28 = vld [vmem:[#allocation5 + $0x488] ss:$16 sps:$4 sm:$0xff]  }
  0xa5   :  { %1603 = vmatpush1.bf16.msra.mxu0 %v4095_v30  ;;  %1815 = vmatpush1.bf16.msra.mxu1 %v4098_v31  ;;  %v4196_v30 = vld [vmem:[#allocation5 + $0x4ac] ss:$16 sps:$4 sm:$0xff]   ;;  %v4191_v31 = vld [vmem:[#allocation5 + $0x4a0] ss:$16 sps:$4 sm:$0xff]  }
  0xa6   :  { %1604 = vmatprep.subr.bf16.mxu0 %v4103_v32  ;;  %1816 = vmatprep.subr.bf16.mxu1 %v4106_v33  ;;  %v4194_v32 = vld [vmem:[#allocation5 + $0x4a8] ss:$16 sps:$4 sm:$0xff]   ;;  %v4199_v33 = vld [vmem:[#allocation5 + $0x4c4] ss:$16 sps:$4 sm:$0xff]  }
  0xa9   :  { %1605 = vmatpush1.bf16.msra.mxu0 %v4101_v35  ;;  %1817 = vmatpush1.bf16.msra.mxu1 %v4104_v36  ;;  %v4197_v35 = vld [vmem:[#allocation5 + $0x4c0] ss:$16 sps:$4 sm:$0xff]   ;;  %v4200_v36 = vld [vmem:[#allocation5 + $0x4c8] ss:$16 sps:$4 sm:$0xff]  }
  0xaa   :  { %1606 = vmatprep.subr.bf16.mxu0 %v4109_v37  ;;  %1818 = vmatprep.subr.bf16.mxu1 %v4112_v38  ;;  %v4205_v37 = vld [vmem:[#allocation5 + $0x4e4] ss:$16 sps:$4 sm:$0xff]   ;;  %v4208_v38 = vld [vmem:[#allocation5 + $0x4ec] ss:$16 sps:$4 sm:$0xff]  }
  0xad   :  { %1607 = vmatpush1.bf16.msra.mxu0 %v4107_v39  ;;  %1819 = vmatpush1.bf16.msra.mxu1 %v4110_v40  ;;  %v4203_v39 = vld [vmem:[#allocation5 + $0x4e0] ss:$16 sps:$4 sm:$0xff]   ;;  %v4206_v40 = vld [vmem:[#allocation5 + $0x4e8] ss:$16 sps:$4 sm:$0xff]  }
  0xae   :  { %1608 = vmatprep.subr.bf16.mxu0 %v4115_v41  ;;  %1820 = vmatprep.subr.bf16.mxu1 %v4118_v42  ;;  %v4211_v41 = vld [vmem:[#allocation5 + $0x504] ss:$16 sps:$4 sm:$0xff]   ;;  %v4214_v42 = vld [vmem:[#allocation5 + $0x50c] ss:$16 sps:$4 sm:$0xff]  }
  0xb1   :  { %1609 = vmatpush1.bf16.msra.mxu0 %v4113_v43  ;;  %1821 = vmatpush1.bf16.msra.mxu1 %v4116_v44  ;;  %v4209_v43 = vld [vmem:[#allocation5 + $0x500] ss:$16 sps:$4 sm:$0xff]   ;;  %v4212_v44 = vld [vmem:[#allocation5 + $0x508] ss:$16 sps:$4 sm:$0xff]  }
  0xb2   :  { %1610 = vmatprep.subr.bf16.mxu0 %v4121_v45  ;;  %1822 = vmatprep.subr.bf16.mxu1 %v4124_v46  ;;  %v4217_v45 = vld [vmem:[#allocation5 + $0x524] ss:$16 sps:$4 sm:$0xff]   ;;  %v4220_v46 = vld [vmem:[#allocation5 + $0x52c] ss:$16 sps:$4 sm:$0xff]  }
  0xb5   :  { %1611 = vmatpush1.bf16.msra.mxu0 %v4119_v47  ;;  %1823 = vmatpush1.bf16.msra.mxu1 %v4122_v48  ;;  %v4215_v47 = vld [vmem:[#allocation5 + $0x520] ss:$16 sps:$4 sm:$0xff]   ;;  %v4218_v48 = vld [vmem:[#allocation5 + $0x528] ss:$16 sps:$4 sm:$0xff]  }
  0xb6   :  { %1612 = vmatprep.subr.bf16.mxu0 %v4127_v49  ;;  %1824 = vmatprep.subr.bf16.mxu1 %v4130_v50  ;;  %v4223_v49 = vld [vmem:[#allocation5 + $0x544] ss:$16 sps:$4 sm:$0xff]   ;;  %v4226_v50 = vld [vmem:[#allocation5 + $0x54c] ss:$16 sps:$4 sm:$0xff]  }
  0xb9   :  { %1613 = vmatpush1.bf16.msra.mxu0 %v4125_v51  ;;  %1825 = vmatpush1.bf16.msra.mxu1 %v4128_v52  ;;  %v4221_v51 = vld [vmem:[#allocation5 + $0x540] ss:$16 sps:$4 sm:$0xff]   ;;  %v4224_v52 = vld [vmem:[#allocation5 + $0x548] ss:$16 sps:$4 sm:$0xff]  }
  0xba   :  { %1614 = vmatprep.subr.bf16.mxu0 %v4133_v53  ;;  %1826 = vmatprep.subr.bf16.mxu1 %v4136_v54  ;;  %v4229_v53 = vld [vmem:[#allocation5 + $0x564] ss:$16 sps:$4 sm:$0xff]   ;;  %v4232_v54 = vld [vmem:[#allocation5 + $0x56c] ss:$16 sps:$4 sm:$0xff]  }
  0xbd   :  { %1615 = vmatpush1.bf16.msra.mxu0 %v4131_v55  ;;  %1827 = vmatpush1.bf16.msra.mxu1 %v4134_v56  ;;  %v4227_v55 = vld [vmem:[#allocation5 + $0x560] ss:$16 sps:$4 sm:$0xff]   ;;  %v4230_v56 = vld [vmem:[#allocation5 + $0x568] ss:$16 sps:$4 sm:$0xff]  }
  0xbe   :  { %1616 = vmatprep.subr.bf16.mxu0 %v4139_v57  ;;  %1828 = vmatprep.subr.bf16.mxu1 %v4142_v58  ;;  %v4235_v57 = vld [vmem:[#allocation5 + $0x584] ss:$16 sps:$4 sm:$0xff]   ;;  %v4238_v58 = vld [vmem:[#allocation5 + $0x58c] ss:$16 sps:$4 sm:$0xff]  }
  0xc1   :  { %1617 = vmatpush1.bf16.msra.mxu0 %v4137_v59  ;;  %1829 = vmatpush1.bf16.msra.mxu1 %v4140_v60  ;;  %v4233_v59 = vld [vmem:[#allocation5 + $0x580] ss:$16 sps:$4 sm:$0xff]   ;;  %v4236_v60 = vld [vmem:[#allocation5 + $0x588] ss:$16 sps:$4 sm:$0xff]  }
  0xc2   :  { %1618 = vmatprep.subr.bf16.mxu0 %v4147_v61  ;;  %1830 = vmatprep.subr.bf16.mxu1 %v4150_v62  ;;  %v4241_v61 = vld [vmem:[#allocation5 + $0x5a4] ss:$16 sps:$4 sm:$0xff]   ;;  %v4244_v62 = vld [vmem:[#allocation5 + $0x5ac] ss:$16 sps:$4 sm:$0xff]  }
  0xc5   :  { %1619 = vmatpush1.bf16.msra.mxu0 %v4145_v63  ;;  %1831 = vmatpush1.bf16.msra.mxu1 %v4148_v0  ;;  %v4239_v63 = vld [vmem:[#allocation5 + $0x5a0] ss:$16 sps:$4 sm:$0xff]   ;;  %v4242_v0 = vld [vmem:[#allocation5 + $0x5a8] ss:$16 sps:$4 sm:$0xff]  }
  0xc6   :  { %1620 = vmatprep.subr.bf16.mxu0 %v4154_v1  ;;  %1832 = vmatprep.subr.bf16.mxu1 %v4157_v2  ;;  %v4249_v1 = vld [vmem:[#allocation5 + $0x5c4] ss:$16 sps:$4 sm:$0xff]   ;;  %v4252_v2 = vld [vmem:[#allocation5 + $0x5cc] ss:$16 sps:$4 sm:$0xff]  }
  0xc9   :  { %1621 = vmatpush1.bf16.msra.mxu0 %v4152_v3  ;;  %1833 = vmatpush1.bf16.msra.mxu1 %v4155_v4  ;;  %v4247_v3 = vld [vmem:[#allocation5 + $0x5c0] ss:$16 sps:$4 sm:$0xff]   ;;  %v4250_v4 = vld [vmem:[#allocation5 + $0x5c8] ss:$16 sps:$4 sm:$0xff]  }
  0xca   :  { %1643 = vmatprep.subr.bf16.mxu0 %v4163_v5  ;;  %1855 = vmatprep.subr.bf16.mxu1 %v4166_v6  ;;  %v4256_v5 = vld [vmem:[#allocation5 + $0x5e4] ss:$16 sps:$4 sm:$0xff]   ;;  %v4259_v6 = vld [vmem:[#allocation5 + $0x5ec] ss:$16 sps:$4 sm:$0xff]  }
  0xcc   :  { %1623 = vmatmul.mubr.bf16.vlgmr.msra.gmra.mrb[0].mxu0 %v4158_v7  ;;  %1835 = vmatmul.mubr.bf16.vlgmr.msra.gmra.mrb[0].mxu1 %v4158_v7  ;;  %v4254_v7 = vld [vmem:[#allocation5 + $0x5e0] ss:$16 sps:$4 sm:$0xff]  }
  0xcd   :  { %1644 = vmatpush1.bf16.msra.mxu0 %v4161_v8  ;;  %1856 = vmatpush1.bf16.msra.mxu1 %v4164_v9  ;;  %v4257_v8 = vld [vmem:[#allocation5 + $0x5e8] ss:$16 sps:$4 sm:$0xff]   ;;  %v4265_v9 = vld [vmem:[#allocation5 + $0x604] ss:$16 sps:$4 sm:$0xff]  }
  0xce   :  { %1645 = vmatprep.subr.bf16.mxu0 %v4169_v10  ;;  %1857 = vmatprep.subr.bf16.mxu1 %v4172_v11  ;;  %v4268_v10 = vld [vmem:[#allocation5 + $0x60c] ss:$16 sps:$4 sm:$0xff]  }
  0xcf   :  { %1632 = vmatprep.mubr.bf16.mxu0 %v4245_v12  ;;  %1844 = vmatprep.mubr.bf16.mxu1 %v4245_v12  ;;  %v4260_v11 = vld [vmem:[#allocation2 + $0x10] ss:$28 sps:$4 sm:$0xff]  }
  0xd0   :  { %v4263_v12 = vld [vmem:[#allocation5 + $0x600] ss:$16 sps:$4 sm:$0xff]  }
  0xd1   :  { %1646 = vmatpush1.bf16.msra.mxu0 %v4167_v13  ;;  %1858 = vmatpush1.bf16.msra.mxu1 %v4170_v14  ;;  %v4266_v13 = vld [vmem:[#allocation5 + $0x608] ss:$16 sps:$4 sm:$0xff]   ;;  %v4271_v14 = vld [vmem:[#allocation5 + $0x624] ss:$16 sps:$4 sm:$0xff]  }
  0xd2   :  { %1647 = vmatprep.subr.bf16.mxu0 %v4175_v15  ;;  %1859 = vmatprep.subr.bf16.mxu1 %v4178_v16  ;;  %v4274_v15 = vld [vmem:[#allocation5 + $0x62c] ss:$16 sps:$4 sm:$0xff]  }
  0xd3   :  { %v4299_v16 = vld [vmem:[#allocation2 + $0x4c] ss:$28 sps:$4 sm:$0xff]  }
  0xd4   :  { %1633 = vmatmul.mubr.bf16.gmra.mrb[4].mxu0 %v4253_v19  ;;  %1845 = vmatmul.mubr.bf16.gmra.mrb[4].mxu1 %v4253_v19  ;;  %v4277_v19 = vld [vmem:[#allocation5 + $0x644] ss:$16 sps:$4 sm:$0xff]  }
  0xd5   :  { %1648 = vmatpush1.bf16.msra.mxu0 %v4173_v17  ;;  %1860 = vmatpush1.bf16.msra.mxu1 %v4176_v18  ;;  %v4269_v17 = vld [vmem:[#allocation5 + $0x620] ss:$16 sps:$4 sm:$0xff]   ;;  %v4272_v18 = vld [vmem:[#allocation5 + $0x628] ss:$16 sps:$4 sm:$0xff]  }
  0xd6   :  { %1649 = vmatprep.subr.bf16.mxu0 %v4181_v20  ;;  %1861 = vmatprep.subr.bf16.mxu1 %v4184_v21  ;;  %v4280_v20 = vld [vmem:[#allocation5 + $0x64c] ss:$16 sps:$4 sm:$0xff]   ;;  %v4301_v21 = vld [vmem:[#allocation2 + $0x48] ss:$28 sps:$4 sm:$0xff]  }
  0xd7   :  { %1675 = vmatprep.mubr.bf16.mxu0 %v4262_v22  ;;  %1887 = vmatprep.mubr.bf16.mxu1 %v4262_v22  ;;  %v4275_v22 = vld [vmem:[#allocation5 + $0x640] ss:$16 sps:$4 sm:$0xff]  }
  0xd9   :  { %1650 = vmatpush1.bf16.msra.mxu0 %v4179_v23  ;;  %1862 = vmatpush1.bf16.msra.mxu1 %v4182_v24  ;;  %v4278_v23 = vld [vmem:[#allocation5 + $0x648] ss:$16 sps:$4 sm:$0xff]   ;;  %v4283_v24 = vld [vmem:[#allocation5 + $0x664] ss:$16 sps:$4 sm:$0xff]  }
  0xda   :  { %1651 = vmatprep.subr.bf16.mxu0 %v4187_v25  ;;  %1863 = vmatprep.subr.bf16.mxu1 %v4190_v26  ;;  %v4286_v25 = vld [vmem:[#allocation5 + $0x66c] ss:$16 sps:$4 sm:$0xff]   ;;  %v4281_v26 = vld [vmem:[#allocation5 + $0x660] ss:$16 sps:$4 sm:$0xff]  }
  0xdd   :  { %1652 = vmatpush1.bf16.msra.mxu0 %v4185_v27  ;;  %1864 = vmatpush1.bf16.msra.mxu1 %v4188_v28  ;;  %v4284_v27 = vld [vmem:[#allocation5 + $0x668] ss:$16 sps:$4 sm:$0xff]   ;;  %v4289_v28 = vld [vmem:[#allocation5 + $0x684] ss:$16 sps:$4 sm:$0xff]  }
  0xde   :  { %1653 = vmatprep.subr.bf16.mxu0 %v4193_v29  ;;  %1865 = vmatprep.subr.bf16.mxu1 %v4196_v30  ;;  %v4292_v29 = vld [vmem:[#allocation5 + $0x68c] ss:$16 sps:$4 sm:$0xff]   ;;  %v4287_v30 = vld [vmem:[#allocation5 + $0x680] ss:$16 sps:$4 sm:$0xff]  }
  0xe1   :  { %1654 = vmatpush1.bf16.msra.mxu0 %v4191_v31  ;;  %1866 = vmatpush1.bf16.msra.mxu1 %v4194_v32  ;;  %v4290_v31 = vld [vmem:[#allocation5 + $0x688] ss:$16 sps:$4 sm:$0xff]   ;;  %v4668_v32 = vmov 0  }
  0xe2   :  { %1655 = vmatprep.subr.bf16.mxu0 %v4199_v33  ;;  %1867 = vmatprep.subr.bf16.mxu1 %v4202_v34  ;;  %v4295_v33 = vld [vmem:[#allocation5 + $0x6a4] ss:$16 sps:$4 sm:$0xff]   ;;  %v4298_v34 = vld [vmem:[#allocation5 + $0x6ac] ss:$16 sps:$4 sm:$0xff]  }
  0xe5   :  { %1656 = vmatpush1.bf16.msra.mxu0 %v4197_v35  ;;  %1868 = vmatpush1.bf16.msra.mxu1 %v4200_v36  ;;  %v4293_v35 = vld [vmem:[#allocation5 + $0x6a0] ss:$16 sps:$4 sm:$0xff]   ;;  %v4296_v36 = vld [vmem:[#allocation5 + $0x6a8] ss:$16 sps:$4 sm:$0xff]  }
  0xe6   :  { %1657 = vmatprep.subr.bf16.mxu0 %v4205_v37  ;;  %1869 = vmatprep.subr.bf16.mxu1 %v4208_v38  ;;  %v4304_v37 = vld [vmem:[#allocation5 + $0x6c4] ss:$16 sps:$4 sm:$0xff]   ;;  %v4307_v38 = vld [vmem:[#allocation5 + $0x6cc] ss:$16 sps:$4 sm:$0xff]  }
  0xe9   :  { %1658 = vmatpush1.bf16.msra.mxu0 %v4203_v39  ;;  %1870 = vmatpush1.bf16.msra.mxu1 %v4206_v40  ;;  %v4302_v39 = vld [vmem:[#allocation5 + $0x6c0] ss:$16 sps:$4 sm:$0xff]   ;;  %v4305_v40 = vld [vmem:[#allocation5 + $0x6c8] ss:$16 sps:$4 sm:$0xff]  }
  0xea   :  { %1659 = vmatprep.subr.bf16.mxu0 %v4211_v41  ;;  %1871 = vmatprep.subr.bf16.mxu1 %v4214_v42  ;;  %v4310_v41 = vld [vmem:[#allocation5 + $0x6e4] ss:$16 sps:$4 sm:$0xff]   ;;  %v4313_v42 = vld [vmem:[#allocation5 + $0x6ec] ss:$16 sps:$4 sm:$0xff]  }
  0xed   :  { %1660 = vmatpush1.bf16.msra.mxu0 %v4209_v43  ;;  %1872 = vmatpush1.bf16.msra.mxu1 %v4212_v44  ;;  %v4308_v43 = vld [vmem:[#allocation5 + $0x6e0] ss:$16 sps:$4 sm:$0xff]   ;;  %v4311_v44 = vld [vmem:[#allocation5 + $0x6e8] ss:$16 sps:$4 sm:$0xff]  }
  0xee   :  { %1661 = vmatprep.subr.bf16.mxu0 %v4217_v45  ;;  %1873 = vmatprep.subr.bf16.mxu1 %v4220_v46  ;;  %v4318_v45 = vld [vmem:[#allocation7 + $0x4] ss:$16 sps:$4 sm:$0xff]   ;;  %v4321_v46 = vld [vmem:[#allocation7 + $0xc] ss:$16 sps:$4 sm:$0xff]  }
  0xf1   :  { %1662 = vmatpush1.bf16.msra.mxu0 %v4215_v47  ;;  %1874 = vmatpush1.bf16.msra.mxu1 %v4218_v48  ;;  %v4314_v47 = vld [vmem:[#allocation2 + $0x18] ss:$28 sps:$4 sm:$0xff]   ;;  %v4316_v48 = vld [vmem:[#allocation7] ss:$16 sps:$4 sm:$0xff]  }
  0xf2   :  { %1663 = vmatprep.subr.bf16.mxu0 %v4223_v49  ;;  %1875 = vmatprep.subr.bf16.mxu1 %v4226_v50  ;;  %v4319_v49 = vld [vmem:[#allocation7 + $0x8] ss:$16 sps:$4 sm:$0xff]   ;;  %v4324_v50 = vld [vmem:[#allocation7 + $0x24] ss:$16 sps:$4 sm:$0xff]  }
  0xf5   :  { %1664 = vmatpush1.bf16.msra.mxu0 %v4221_v51  ;;  %1876 = vmatpush1.bf16.msra.mxu1 %v4224_v52  ;;  %v4327_v51 = vld [vmem:[#allocation7 + $0x2c] ss:$16 sps:$4 sm:$0xff]   ;;  %v4322_v52 = vld [vmem:[#allocation7 + $0x20] ss:$16 sps:$4 sm:$0xff]  }
  0xf6   :  { %1665 = vmatprep.subr.bf16.mxu0 %v4229_v53  ;;  %1877 = vmatprep.subr.bf16.mxu1 %v4232_v54  ;;  %v4325_v53 = vld [vmem:[#allocation7 + $0x28] ss:$16 sps:$4 sm:$0xff]   ;;  %v4330_v54 = vld [vmem:[#allocation7 + $0x44] ss:$16 sps:$4 sm:$0xff]  }
  0xf9   :  { %1666 = vmatpush1.bf16.msra.mxu0 %v4227_v55  ;;  %1878 = vmatpush1.bf16.msra.mxu1 %v4230_v56  ;;  %v4333_v55 = vld [vmem:[#allocation7 + $0x4c] ss:$16 sps:$4 sm:$0xff]  }
  0xfa   :  { %1667 = vmatprep.subr.bf16.mxu0 %v4235_v57  ;;  %1879 = vmatprep.subr.bf16.mxu1 %v4238_v58  ;;  %v4315_v56 = vld [vmem:[#allocation2 + $0x50] ss:$28 sps:$4 sm:$0xff]   ;;  %v4331_v58 = vld [vmem:[#allocation7 + $0x48] ss:$16 sps:$4 sm:$0xff]  }
  0xfb   :  { %v4328_v57 = vld [vmem:[#allocation7 + $0x40] ss:$16 sps:$4 sm:$0xff]  }
  0xfd   :  { %1668 = vmatpush1.bf16.msra.mxu0 %v4233_v59  ;;  %1880 = vmatpush1.bf16.msra.mxu1 %v4236_v60  ;;  %v4336_v59 = vld [vmem:[#allocation7 + $0x64] ss:$16 sps:$4 sm:$0xff]   ;;  %v4339_v60 = vld [vmem:[#allocation7 + $0x6c] ss:$16 sps:$4 sm:$0xff]  }
  0xfe   :  { %1669 = vmatprep.subr.bf16.mxu0 %v4241_v61  ;;  %1881 = vmatprep.subr.bf16.mxu1 %v4244_v62  ;;  %v4334_v61 = vld [vmem:[#allocation7 + $0x60] ss:$16 sps:$4 sm:$0xff]   ;;  %v4337_v62 = vld [vmem:[#allocation7 + $0x68] ss:$16 sps:$4 sm:$0xff]  }
 0x101   :  { %1670 = vmatpush1.bf16.msra.mxu0 %v4239_v63  ;;  %1882 = vmatpush1.bf16.msra.mxu1 %v4242_v0  ;;  %v4342_v63 = vld [vmem:[#allocation7 + $0x84] ss:$16 sps:$4 sm:$0xff]   ;;  %v4345_v0 = vld [vmem:[#allocation7 + $0x8c] ss:$16 sps:$4 sm:$0xff]  }
 0x102   :  { %1671 = vmatprep.subr.bf16.mxu0 %v4249_v1  ;;  %1883 = vmatprep.subr.bf16.mxu1 %v4252_v2  ;;  %v4340_v1 = vld [vmem:[#allocation7 + $0x80] ss:$16 sps:$4 sm:$0xff]   ;;  %v4343_v2 = vld [vmem:[#allocation7 + $0x88] ss:$16 sps:$4 sm:$0xff]  }
 0x105   :  { %1672 = vmatpush1.bf16.msra.mxu0 %v4247_v3  ;;  %1884 = vmatpush1.bf16.msra.mxu1 %v4250_v4  ;;  %v4348_v3 = vld [vmem:[#allocation7 + $0xa4] ss:$16 sps:$4 sm:$0xff]   ;;  %v4351_v4 = vld [vmem:[#allocation7 + $0xac] ss:$16 sps:$4 sm:$0xff]  }
 0x106   :  { %1673 = vmatprep.subr.bf16.mxu0 %v4256_v5  ;;  %1885 = vmatprep.subr.bf16.mxu1 %v4259_v6  ;;  %v4346_v5 = vld [vmem:[#allocation7 + $0xa0] ss:$16 sps:$4 sm:$0xff]   ;;  %v4349_v6 = vld [vmem:[#allocation7 + $0xa8] ss:$16 sps:$4 sm:$0xff]  }
 0x109   :  { %1674 = vmatpush1.bf16.msra.mxu0 %v4254_v7  ;;  %1886 = vmatpush1.bf16.msra.mxu1 %v4257_v8  ;;  %v4354_v7 = vld [vmem:[#allocation7 + $0xc4] ss:$16 sps:$4 sm:$0xff]   ;;  %v4357_v8 = vld [vmem:[#allocation7 + $0xcc] ss:$16 sps:$4 sm:$0xff]  }
 0x10a   :  { %1696 = vmatprep.subr.bf16.mxu0 %v4265_v9  ;;  %1908 = vmatprep.subr.bf16.mxu1 %v4268_v10  ;;  %v4352_v9 = vld [vmem:[#allocation7 + $0xc0] ss:$16 sps:$4 sm:$0xff]   ;;  %v4355_v10 = vld [vmem:[#allocation7 + $0xc8] ss:$16 sps:$4 sm:$0xff]  }
 0x10c   :  { %1676 = vmatmul.mubr.bf16.vlgmr.msra.gmra.mrb[0].mxu0 %v4260_v11  ;;  %1888 = vmatmul.mubr.bf16.vlgmr.msra.gmra.mrb[0].mxu1 %v4260_v11  ;;  %v4360_v11 = vld [vmem:[#allocation7 + $0xe4] ss:$16 sps:$4 sm:$0xff]  }
 0x10d   :  { %1697 = vmatpush1.bf16.msra.mxu0 %v4263_v12  ;;  %1909 = vmatpush1.bf16.msra.mxu1 %v4266_v13  ;;  %v4363_v12 = vld [vmem:[#allocation7 + $0xec] ss:$16 sps:$4 sm:$0xff]   ;;  %v4358_v13 = vld [vmem:[#allocation7 + $0xe0] ss:$16 sps:$4 sm:$0xff]  }
 0x10e   :  { %1698 = vmatprep.subr.bf16.mxu0 %v4271_v14  ;;  %1910 = vmatprep.subr.bf16.mxu1 %v4274_v15  ;;  %v4361_v14 = vld [vmem:[#allocation7 + $0xe8] ss:$16 sps:$4 sm:$0xff]   ;;  %v4366_v15 = vld [vmem:[#allocation7 + $0x104] ss:$16 sps:$4 sm:$0xff]  }
 0x10f   :  { %1685 = vmatprep.mubr.bf16.mxu0 %v4299_v16  ;;  %1897 = vmatprep.mubr.bf16.mxu1 %v4299_v16  ;;  %v4369_v16 = vld [vmem:[#allocation7 + $0x10c] ss:$16 sps:$4 sm:$0xff]  }
 0x111   :  { %1699 = vmatpush1.bf16.msra.mxu0 %v4269_v17  ;;  %1911 = vmatpush1.bf16.msra.mxu1 %v4272_v18  ;;  %v4364_v17 = vld [vmem:[#allocation7 + $0x100] ss:$16 sps:$4 sm:$0xff]   ;;  %v4367_v18 = vld [vmem:[#allocation7 + $0x108] ss:$16 sps:$4 sm:$0xff]  }
 0x112   :  { %1700 = vmatprep.subr.bf16.mxu0 %v4277_v19  ;;  %1912 = vmatprep.subr.bf16.mxu1 %v4280_v20  ;;  %v4372_v19 = vld [vmem:[#allocation7 + $0x124] ss:$16 sps:$4 sm:$0xff]   ;;  %v4375_v20 = vld [vmem:[#allocation7 + $0x12c] ss:$16 sps:$4 sm:$0xff]  }
 0x114   :  { %1686 = vmatmul.mubr.bf16.gmra.mrb[4].mxu0 %v4301_v21  ;;  %1898 = vmatmul.mubr.bf16.gmra.mrb[4].mxu1 %v4301_v21  ;;  %v4370_v21 = vld [vmem:[#allocation7 + $0x120] ss:$16 sps:$4 sm:$0xff]  }
 0x115   :  { %1701 = vmatpush1.bf16.msra.mxu0 %v4275_v22  ;;  %1913 = vmatpush1.bf16.msra.mxu1 %v4278_v23  ;;  %v4373_v22 = vld [vmem:[#allocation7 + $0x128] ss:$16 sps:$4 sm:$0xff]   ;;  %v4378_v23 = vld [vmem:[#allocation7 + $0x144] ss:$16 sps:$4 sm:$0xff]  }
 0x116   :  { %1702 = vmatprep.subr.bf16.mxu0 %v4283_v24  ;;  %1914 = vmatprep.subr.bf16.mxu1 %v4286_v25  ;;  %v4381_v24 = vld [vmem:[#allocation7 + $0x14c] ss:$16 sps:$4 sm:$0xff]   ;;  %v4376_v25 = vld [vmem:[#allocation7 + $0x140] ss:$16 sps:$4 sm:$0xff]  }
 0x117   :  { %1728 = vmatprep.mubr.bf16.mxu0 %v4668_v32  ;;  %1940 = vmatprep.mubr.bf16.mxu1 %v4668_v32 }
 0x119   :  { %1703 = vmatpush1.bf16.msra.mxu0 %v4281_v26  ;;  %1915 = vmatpush1.bf16.msra.mxu1 %v4284_v27  ;;  %v4379_v26 = vld [vmem:[#allocation7 + $0x148] ss:$16 sps:$4 sm:$0xff]   ;;  %v4384_v27 = vld [vmem:[#allocation7 + $0x164] ss:$16 sps:$4 sm:$0xff]  }
 0x11a   :  { %1704 = vmatprep.subr.bf16.mxu0 %v4289_v28  ;;  %1916 = vmatprep.subr.bf16.mxu1 %v4292_v29  ;;  %v4387_v28 = vld [vmem:[#allocation7 + $0x16c] ss:$16 sps:$4 sm:$0xff]   ;;  %v4382_v29 = vld [vmem:[#allocation7 + $0x160] ss:$16 sps:$4 sm:$0xff]  }
 0x11d   :  { %1705 = vmatpush1.bf16.msra.mxu0 %v4287_v30  ;;  %1917 = vmatpush1.bf16.msra.mxu1 %v4290_v31  ;;  %v4385_v30 = vld [vmem:[#allocation7 + $0x168] ss:$16 sps:$4 sm:$0xff]   ;;  %v4390_v31 = vld [vmem:[#allocation7 + $0x184] ss:$16 sps:$4 sm:$0xff]  }
 0x11e   :  { %1706 = vmatprep.subr.bf16.mxu0 %v4295_v33  ;;  %1918 = vmatprep.subr.bf16.mxu1 %v4298_v34  ;;  %v4388_v33 = vld [vmem:[#allocation7 + $0x180] ss:$16 sps:$4 sm:$0xff]   ;;  %v4391_v34 = vld [vmem:[#allocation7 + $0x188] ss:$16 sps:$4 sm:$0xff]  }
 0x121   :  { %1707 = vmatpush1.bf16.msra.mxu0 %v4293_v35  ;;  %1919 = vmatpush1.bf16.msra.mxu1 %v4296_v36  ;;  %v4396_v35 = vld [vmem:[#allocation7 + $0x1a4] ss:$16 sps:$4 sm:$0xff]   ;;  %v4399_v36 = vld [vmem:[#allocation7 + $0x1ac] ss:$16 sps:$4 sm:$0xff]  }
 0x122   :  { %1708 = vmatprep.subr.bf16.mxu0 %v4304_v37  ;;  %1920 = vmatprep.subr.bf16.mxu1 %v4307_v38  ;;  %v4394_v37 = vld [vmem:[#allocation7 + $0x1a0] ss:$16 sps:$4 sm:$0xff]   ;;  %v4397_v38 = vld [vmem:[#allocation7 + $0x1a8] ss:$16 sps:$4 sm:$0xff]  }
 0x125   :  { %1709 = vmatpush1.bf16.msra.mxu0 %v4302_v39  ;;  %1921 = vmatpush1.bf16.msra.mxu1 %v4305_v40  ;;  %v4402_v39 = vld [vmem:[#allocation7 + $0x1c4] ss:$16 sps:$4 sm:$0xff]   ;;  %v4405_v40 = vld [vmem:[#allocation7 + $0x1cc] ss:$16 sps:$4 sm:$0xff]  }
 0x126   :  { %1710 = vmatprep.subr.bf16.mxu0 %v4310_v41  ;;  %1922 = vmatprep.subr.bf16.mxu1 %v4313_v42  ;;  %v4400_v41 = vld [vmem:[#allocation7 + $0x1c0] ss:$16 sps:$4 sm:$0xff]   ;;  %v4403_v42 = vld [vmem:[#allocation7 + $0x1c8] ss:$16 sps:$4 sm:$0xff]  }
 0x129   :  { %1711 = vmatpush1.bf16.msra.mxu0 %v4308_v43  ;;  %1923 = vmatpush1.bf16.msra.mxu1 %v4311_v44  ;;  %v4408_v43 = vld [vmem:[#allocation7 + $0x1e4] ss:$16 sps:$4 sm:$0xff]   ;;  %v4411_v44 = vld [vmem:[#allocation7 + $0x1ec] ss:$16 sps:$4 sm:$0xff]  }
 0x12a   :  { %2775 = vmatprep.subr.bf16.mxu0 %v4318_v45  ;;  %2881 = vmatprep.subr.bf16.mxu1 %v4321_v46  ;;  %v4406_v45 = vld [vmem:[#allocation7 + $0x1e0] ss:$16 sps:$4 sm:$0xff]   ;;  %v4409_v46 = vld [vmem:[#allocation7 + $0x1e8] ss:$16 sps:$4 sm:$0xff]  }
 0x12c   :  { %1729 = vmatmul.mubr.bf16.vlgmr.msra.gmra.mrb[0].mxu0 %v4314_v47  ;;  %1941 = vmatmul.mubr.bf16.vlgmr.msra.gmra.mrb[0].mxu1 %v4314_v47  ;;  %v4414_v47 = vld [vmem:[#allocation7 + $0x204] ss:$16 sps:$4 sm:$0xff]  }
 0x12d   :  { %1738 = vmatprep.mubr.bf16.mxu0 %v4668_v32  ;;  %1950 = vmatprep.mubr.bf16.mxu1 %v4668_v32  ;;  %v4393_v32 = vld [vmem:[#allocation7 + $0x18c] ss:$16 sps:$4 sm:$0xff]  }
 0x12e   :  { %2776 = vmatpush1.bf16.msra.mxu0 %v4316_v48  ;;  %2882 = vmatpush1.bf16.msra.mxu1 %v4319_v49  ;;  %v4417_v48 = vld [vmem:[#allocation7 + $0x20c] ss:$16 sps:$4 sm:$0xff]   ;;  %v325_v49 = vlaneseq }
 0x12f   :  { %2777 = vmatprep.subr.bf16.mxu0 %v4324_v50  ;;  %2883 = vmatprep.subr.bf16.mxu1 %v4327_v51 }
 0x130   :  { %v4773_v50 = vshrl.u32 %v325_v49, 7 }
 0x132   :  { %2778 = vmatpush1.bf16.msra.mxu0 %v4322_v52  ;;  %2884 = vmatpush1.bf16.msra.mxu1 %v4325_v53  ;;  %v327_v51 = vsub.s32 0, %v4773_v50  ;;  %v335_v52 = vsub.s32 2, %v4773_v50  ;;  %v323_v53 = vld [vmem:[%s4830_s2] sm:$0xf] }
 0x133   :  { %2779 = vmatprep.subr.bf16.mxu0 %v4330_v54  ;;  %2885 = vmatprep.subr.bf16.mxu1 %v4333_v55  ;;  %v331_v54 = vsub.s32 1, %v4773_v50  ;;  %v339_v55 = vsub.s32 3, %v4773_v50 }
 0x134   :  { %1739 = vmatmul.mubr.bf16.gmra.mrb[4].mxu0 %v4315_v56  ;;  %1951 = vmatmul.mubr.bf16.gmra.mrb[4].mxu1 %v4315_v56  ;;  %v328_v56 = vrot.slane %v323_v53, %v327_v51 }
 0x136   :  { %2780 = vmatpush1.bf16.msra.mxu0 %v4328_v57  ;;  %2886 = vmatpush1.bf16.msra.mxu1 %v4331_v58  ;;  %v336_v57 = vrot.slane %v323_v53, %v335_v52  ;;  %v332_v58 = vrot.slane %v323_v53, %v331_v54 }
 0x137   :  { %2781 = vmatprep.subr.bf16.mxu0 %v4336_v59  ;;  %2887 = vmatprep.subr.bf16.mxu1 %v4339_v60  ;;  %v340_v59 = vrot.slane %v323_v53, %v339_v55 }
 0x13a   :  { %2782 = vmatpush1.bf16.msra.mxu0 %v4334_v61  ;;  %2888 = vmatpush1.bf16.msra.mxu1 %v4337_v62 }
 0x13b   :  { %2783 = vmatprep.subr.bf16.mxu0 %v4342_v63  ;;  %2889 = vmatprep.subr.bf16.mxu1 %v4345_v0 }
 0x13e   :  { %2784 = vmatpush1.bf16.msra.mxu0 %v4340_v1  ;;  %2890 = vmatpush1.bf16.msra.mxu1 %v4343_v2 }
 0x13f   :  { %2785 = vmatprep.subr.bf16.mxu0 %v4348_v3  ;;  %2891 = vmatprep.subr.bf16.mxu1 %v4351_v4 }
 0x142   :  { %2786 = vmatpush1.bf16.msra.mxu0 %v4346_v5  ;;  %2892 = vmatpush1.bf16.msra.mxu1 %v4349_v6 }
 0x143   :  { %2787 = vmatprep.subr.bf16.mxu0 %v4354_v7  ;;  %2893 = vmatprep.subr.bf16.mxu1 %v4357_v8 }
 0x146   :  { %2788 = vmatpush1.bf16.msra.mxu0 %v4352_v9  ;;  %2894 = vmatpush1.bf16.msra.mxu1 %v4355_v10 }
 0x147   :  { %2789 = vmatprep.subr.bf16.mxu0 %v4360_v11  ;;  %2895 = vmatprep.subr.bf16.mxu1 %v4363_v12 }
 0x14a   :  { %2790 = vmatpush1.bf16.msra.mxu0 %v4358_v13  ;;  %2896 = vmatpush1.bf16.msra.mxu1 %v4361_v14 }
 0x14b   :  { %2791 = vmatprep.subr.bf16.mxu0 %v4366_v15  ;;  %2897 = vmatprep.subr.bf16.mxu1 %v4369_v16 }
 0x14e   :  { %2792 = vmatpush1.bf16.msra.mxu0 %v4364_v17  ;;  %2898 = vmatpush1.bf16.msra.mxu1 %v4367_v18 }
 0x14f   :  { %2793 = vmatprep.subr.bf16.mxu0 %v4372_v19  ;;  %2899 = vmatprep.subr.bf16.mxu1 %v4375_v20 }
 0x152   :  { %2794 = vmatpush1.bf16.msra.mxu0 %v4370_v21  ;;  %2900 = vmatpush1.bf16.msra.mxu1 %v4373_v22 }
 0x153   :  { %2795 = vmatprep.subr.bf16.mxu0 %v4378_v23  ;;  %2901 = vmatprep.subr.bf16.mxu1 %v4381_v24 }
 0x156   :  { %2796 = vmatpush1.bf16.msra.mxu0 %v4376_v25  ;;  %2902 = vmatpush1.bf16.msra.mxu1 %v4379_v26  ;;  %v4412_v26 = vld [vmem:[#allocation7 + $0x200] ss:$16 sps:$4 sm:$0xff]  }
 0x157   :  { %2797 = vmatprep.subr.bf16.mxu0 %v4384_v27  ;;  %2903 = vmatprep.subr.bf16.mxu1 %v4387_v28  ;;  %v4415_v27 = vld [vmem:[#allocation7 + $0x208] ss:$16 sps:$4 sm:$0xff]  }
 0x15a   :  { %2798 = vmatpush1.bf16.msra.mxu0 %v4382_v29  ;;  %2904 = vmatpush1.bf16.msra.mxu1 %v4385_v30 }
 0x15b   :  { %2799 = vmatprep.subr.bf16.mxu0 %v4390_v31  ;;  %2905 = vmatprep.subr.bf16.mxu1 %v4393_v32  ;;  %v4420_v32 = vld [vmem:[#allocation7 + $0x224] ss:$16 sps:$4 sm:$0xff]  }
 0x15e   :  { %2800 = vmatpush1.bf16.msra.mxu0 %v4388_v33  ;;  %2906 = vmatpush1.bf16.msra.mxu1 %v4391_v34  ;;  %v4423_v33 = vld [vmem:[#allocation7 + $0x22c] ss:$16 sps:$4 sm:$0xff]  }
 0x15f   :  { %2801 = vmatprep.subr.bf16.mxu0 %v4396_v35  ;;  %2907 = vmatprep.subr.bf16.mxu1 %v4399_v36 }
 0x162   :  { %2802 = vmatpush1.bf16.msra.mxu0 %v4394_v37  ;;  %2908 = vmatpush1.bf16.msra.mxu1 %v4397_v38 }
 0x163   :  { %2803 = vmatprep.subr.bf16.mxu0 %v4402_v39  ;;  %2909 = vmatprep.subr.bf16.mxu1 %v4405_v40 }
 0x166   :  { %2804 = vmatpush1.bf16.msra.mxu0 %v4400_v41  ;;  %2910 = vmatpush1.bf16.msra.mxu1 %v4403_v42 }
 0x167   :  { %2805 = vmatprep.subr.bf16.mxu0 %v4408_v43  ;;  %2911 = vmatprep.subr.bf16.mxu1 %v4411_v44  ;;  %v4418_v44 = vld [vmem:[#allocation7 + $0x220] ss:$16 sps:$4 sm:$0xff]  }
 0x16a   :  { %2806 = vmatpush1.bf16.msra.mxu0 %v4406_v45  ;;  %2912 = vmatpush1.bf16.msra.mxu1 %v4409_v46  ;;  %v4421_v45 = vld [vmem:[#allocation7 + $0x228] ss:$16 sps:$4 sm:$0xff]   ;;  %v4426_v46 = vld [vmem:[#allocation7 + $0x244] ss:$16 sps:$4 sm:$0xff]  }
 0x16b   :  { %2828 = vmatprep.subr.bf16.mxu0 %v4414_v47  ;;  %2934 = vmatprep.subr.bf16.mxu1 %v4417_v48 }
 0x1ff   :  { %v1730_v60 = vpop.f32.mrb[0].mxu0  ;;  %v1942_v61 = vpop.f32.mrb[0].mxu1 }
 0x200   :  { %v3850_v62 = vadd.f32 %v1730_v60, %v328_v56  ;;  %v3858_v63 = vadd.f32 %v1942_v61, %v336_v57  ;;  %v1732_v0 = vpop.f32.mrb[1].mxu0  ;;  %v1944_v1 = vpop.f32.mrb[1].mxu1  ;;  %v4429_v60 = vld [vmem:[#allocation7 + $0x24c] ss:$16 sps:$4 sm:$0xff]  }
 0x201   :  { %v3851_v2 = vadd.f32 %v1732_v0, %v332_v58  ;;  %v3859_v3 = vadd.f32 %v1944_v1, %v340_v59  ;;  %v1734_v4 = vpop.f32.mrb[2].mxu0  ;;  %v1946_v5 = vpop.f32.mrb[2].mxu1  ;;  %v4424_v1 = vld [vmem:[#allocation7 + $0x240] ss:$16 sps:$4 sm:$0xff]  }
 0x202   :  { %v3852_v6 = vadd.f32 %v1734_v4, %v328_v56  ;;  %v3860_v7 = vadd.f32 %v1946_v5, %v336_v57  ;;  %v1736_v8 = vpop.f32.mrb[3].mxu0  ;;  %v1948_v9 = vpop.f32.mrb[3].mxu1  ;;  %v1961_v12 = vmax.f32 %v3850_v62, 0.0  ;;  %v1963_v13 = vmax.f32 %v3858_v63, 0.0  ;;  %v4435_v4 = vld [vmem:[#allocation7 + $0x26c] ss:$16 sps:$4 sm:$0xff]  }
 0x203   :  { %v3853_v10 = vadd.f32 %v1736_v8, %v332_v58  ;;  %v3861_v11 = vadd.f32 %v1948_v9, %v340_v59  ;;  %v1962_v16 = vmax.f32 %v3851_v2, 0.0  ;;  %v1964_v17 = vmax.f32 %v3859_v3, 0.0  ;;  %v4427_v2 = vld [vmem:[#allocation7 + $0x248] ss:$16 sps:$4 sm:$0xff]   ;;  %v4432_v3 = vld [vmem:[#allocation7 + $0x264] ss:$16 sps:$4 sm:$0xff]  }
 0x204   :  { %v1965_v14 = vmax.f32 %v3852_v6, 0.0  ;;  %v1967_v15 = vmax.f32 %v3860_v7, 0.0  ;;  %v4430_v5 = vld [vmem:[#allocation7 + $0x260] ss:$16 sps:$4 sm:$0xff]   ;;  %v4433_v6 = vld [vmem:[#allocation7 + $0x268] ss:$16 sps:$4 sm:$0xff]  }
 0x205   :  { %v1966_v18 = vmax.f32 %v3853_v10, 0.0  ;;  %v1968_v19 = vmax.f32 %v3861_v11, 0.0  ;;  %v4438_v7 = vld [vmem:[#allocation7 + $0x284] ss:$16 sps:$4 sm:$0xff]   ;;  %v4441_v8 = vld [vmem:[#allocation7 + $0x28c] ss:$16 sps:$4 sm:$0xff]  }
 0x206   :  { %v1977_v20 = vpack.c.bf16 %v1965_v14, %v1961_v12  ;;  %v4790_v21 = vpack.c.bf16 %v1967_v15, %v1963_v13  ;;  %v4436_v9 = vld [vmem:[#allocation7 + $0x280] ss:$16 sps:$4 sm:$0xff]   ;;  %v4439_v10 = vld [vmem:[#allocation7 + $0x288] ss:$16 sps:$4 sm:$0xff]   ;;  %v4444_v11 = vld [vmem:[#allocation7 + $0x2a4] ss:$16 sps:$4 sm:$0xff]  }
 0x207   :  { %v1978_v22 = vpack.c.bf16 %v1966_v18, %v1962_v16  ;;  %v1980_v23 = vpack.c.bf16 %v1968_v19, %v1964_v17  ;;  %v1740_v24 = vpop.f32.mrb[4].mxu0  ;;  %v1952_v25 = vpop.f32.mrb[4].mxu1  ;;  %v4447_v12 = vld [vmem:[#allocation7 + $0x2ac] ss:$16 sps:$4 sm:$0xff]   ;;  %v4442_v13 = vld [vmem:[#allocation7 + $0x2a0] ss:$16 sps:$4 sm:$0xff]  }
 0x208   :  { %v3854_v28 = vadd.f32 %v1740_v24, %v328_v56  ;;  %v3862_v29 = vadd.f32 %v1952_v25, %v336_v57  ;;  %v1742_v30 = vpop.f32.mrb[5].mxu0  ;;  %v1954_v31 = vpop.f32.mrb[5].mxu1  ;;  %v4445_v14 = vld [vmem:[#allocation7 + $0x2a8] ss:$16 sps:$4 sm:$0xff]   ;;  %v4450_v15 = vld [vmem:[#allocation7 + $0x2c4] ss:$16 sps:$4 sm:$0xff]  }
 0x209   :  { %v3855_v34 = vadd.f32 %v1742_v30, %v332_v58  ;;  %v3863_v35 = vadd.f32 %v1954_v31, %v340_v59  ;;  %v1744_v36 = vpop.f32.mrb[6].mxu0  ;;  %v1956_v37 = vpop.f32.mrb[6].mxu1  ;;  %2807 = vmatprep.mubr.bf16.mxu0 %v1978_v22  ;;  %2913 = vmatprep.mubr.bf16.mxu1 %v1978_v22  ;;  %v4453_v16 = vld [vmem:[#allocation7 + $0x2cc] ss:$16 sps:$4 sm:$0xff]   ;;  %v4448_v17 = vld [vmem:[#allocation7 + $0x2c0] ss:$16 sps:$4 sm:$0xff]  }
 0x20a   :  { %v3856_v38 = vadd.f32 %v1744_v36, %v328_v56  ;;  %v3864_v39 = vadd.f32 %v1956_v37, %v336_v57  ;;  %v1746_v40 = vpop.f32.mrb[7].mxu0  ;;  %v1958_v41 = vpop.f32.mrb[7].mxu1  ;;  %2808 = vmatmul.mubr.bf16.vlgmr.msra.gmra.mrb[8].mxu0 %v1977_v20  ;;  %2914 = vmatmul.mubr.bf16.vlgmr.msra.gmra.mrb[8].mxu1 %v1977_v20  ;;  %v1969_v47 = vmax.f32 %v3854_v28, 0.0  ;;  %v1971_v48 = vmax.f32 %v3862_v29, 0.0  ;;  %v4451_v18 = vld [vmem:[#allocation7 + $0x2c8] ss:$16 sps:$4 sm:$0xff]  }
 0x20b   :  { %v3857_v42 = vadd.f32 %v1746_v40, %v332_v58  ;;  %v3865_v43 = vadd.f32 %v1958_v41, %v340_v59  ;;  %2829 = vmatpush1.bf16.msra.mxu0 %v4412_v26  ;;  %2935 = vmatpush1.bf16.msra.mxu1 %v4415_v27  ;;  %v1970_v56 = vmax.f32 %v3855_v34, 0.0  ;;  %v1972_v57 = vmax.f32 %v3863_v35, 0.0  ;;  %v4456_v19 = vld [vmem:[#allocation7 + $0x2e4] ss:$16 sps:$4 sm:$0xff]   ;;  %v4459_v20 = vld [vmem:[#allocation7 + $0x2ec] ss:$16 sps:$4 sm:$0xff]  }
 0x20c   :  { %v1973_v49 = vmax.f32 %v3856_v38, 0.0  ;;  %v1975_v53 = vmax.f32 %v3864_v39, 0.0  ;;  %2830 = vmatprep.subr.bf16.mxu0 %v4420_v32  ;;  %2936 = vmatprep.subr.bf16.mxu1 %v4423_v33  ;;  %v4454_v22 = vld [vmem:[#allocation7 + $0x2e0] ss:$16 sps:$4 sm:$0xff]   ;;  %v4462_v24 = vld [vmem:[#allocation7 + $0x304] ss:$16 sps:$4 sm:$0xff]  }
 0x20d   :  { %v1974_v61 = vmax.f32 %v3857_v42, 0.0  ;;  %v1976_v62 = vmax.f32 %v3865_v43, 0.0  ;;  %v4465_v25 = vld [vmem:[#allocation7 + $0x30c] ss:$16 sps:$4 sm:$0xff]   ;;  %v4460_v26 = vld [vmem:[#allocation7 + $0x300] ss:$16 sps:$4 sm:$0xff]  }
 0x20e   :  { %v1981_v63 = vpack.c.bf16 %v1973_v49, %v1969_v47  ;;  %v4792_v0 = vpack.c.bf16 %v1975_v53, %v1971_v48  ;;  %v4463_v27 = vld [vmem:[#allocation7 + $0x308] ss:$16 sps:$4 sm:$0xff]   ;;  %v4468_v28 = vld [vmem:[#allocation7 + $0x324] ss:$16 sps:$4 sm:$0xff]   ;;  %v4471_v29 = vld [vmem:[#allocation7 + $0x32c] ss:$16 sps:$4 sm:$0xff]  }
 0x20f   :  { %v1982_v58 = vpack.c.bf16 %v1974_v61, %v1970_v56  ;;  %v4794_v59 = vpack.c.bf16 %v1976_v62, %v1972_v57  ;;  %2831 = vmatpush1.bf16.msra.mxu0 %v4418_v44  ;;  %2937 = vmatpush1.bf16.msra.mxu1 %v4421_v45  ;;  %v4466_v30 = vld [vmem:[#allocation7 + $0x320] ss:$16 sps:$4 sm:$0xff]   ;;  %v4469_v31 = vld [vmem:[#allocation7 + $0x328] ss:$16 sps:$4 sm:$0xff]   ;;  %v4474_v32 = vld [vmem:[#allocation7 + $0x344] ss:$16 sps:$4 sm:$0xff]  }
 0x210   :  { %2832 = vmatprep.subr.bf16.mxu0 %v4426_v46  ;;  %2938 = vmatprep.subr.bf16.mxu1 %v4429_v60  ;;  %v4477_v33 = vld [vmem:[#allocation7 + $0x34c] ss:$16 sps:$4 sm:$0xff]   ;;  %v4472_v34 = vld [vmem:[#allocation7 + $0x340] ss:$16 sps:$4 sm:$0xff]   ;;  %v4475_v35 = vld [vmem:[#allocation7 + $0x348] ss:$16 sps:$4 sm:$0xff]  }
 0x211   :  { %2817 = vmatprep.mubr.bf16.mxu0 %v1982_v58  ;;  %2923 = vmatprep.mubr.bf16.mxu1 %v1982_v58  ;;  %v4480_v36 = vld [vmem:[#allocation7 + $0x364] ss:$16 sps:$4 sm:$0xff]   ;;  %v4483_v37 = vld [vmem:[#allocation7 + $0x36c] ss:$16 sps:$4 sm:$0xff]   ;;  %v4478_v38 = vld [vmem:[#allocation7 + $0x360] ss:$16 sps:$4 sm:$0xff]  }
 0x212   :  { %2818 = vmatmul.mubr.bf16.gmra.mrb[12].mxu0 %v1981_v63  ;;  %2924 = vmatmul.mubr.bf16.gmra.mrb[12].mxu1 %v1981_v63  ;;  %v4481_v39 = vld [vmem:[#allocation7 + $0x368] ss:$16 sps:$4 sm:$0xff]   ;;  %v4486_v40 = vld [vmem:[#allocation7 + $0x384] ss:$16 sps:$4 sm:$0xff]   ;;  %v4489_v41 = vld [vmem:[#allocation7 + $0x38c] ss:$16 sps:$4 sm:$0xff]  }
 0x213   :  { %2833 = vmatpush1.bf16.msra.mxu0 %v4424_v1  ;;  %2939 = vmatpush1.bf16.msra.mxu1 %v4427_v2  ;;  %v4484_v42 = vld [vmem:[#allocation7 + $0x380] ss:$16 sps:$4 sm:$0xff]   ;;  %v4487_v43 = vld [vmem:[#allocation7 + $0x388] ss:$16 sps:$4 sm:$0xff]   ;;  %v4492_v44 = vld [vmem:[#allocation7 + $0x3a4] ss:$16 sps:$4 sm:$0xff]  }
 0x214   :  { %2860 = vmatprep.mubr.bf16.mxu0 %v1980_v23  ;;  %2966 = vmatprep.mubr.bf16.mxu1 %v1980_v23  ;;  %v4457_v23 = vld [vmem:[#allocation7 + $0x2e8] ss:$16 sps:$4 sm:$0xff]   ;;  %v4495_v45 = vld [vmem:[#allocation7 + $0x3ac] ss:$16 sps:$4 sm:$0xff]   ;;  %v4490_v46 = vld [vmem:[#allocation7 + $0x3a0] ss:$16 sps:$4 sm:$0xff]  }
 0x215   :  { %2834 = vmatprep.subr.bf16.mxu0 %v4432_v3  ;;  %2940 = vmatprep.subr.bf16.mxu1 %v4435_v4  ;;  %v4493_v47 = vld [vmem:[#allocation7 + $0x3a8] ss:$16 sps:$4 sm:$0xff]   ;;  %v4498_v48 = vld [vmem:[#allocation7 + $0x3c4] ss:$16 sps:$4 sm:$0xff]   ;;  %v4501_v49 = vld [vmem:[#allocation7 + $0x3cc] ss:$16 sps:$4 sm:$0xff]  }
 0x216   :  { %v4496_v53 = vld [vmem:[#allocation7 + $0x3c0] ss:$16 sps:$4 sm:$0xff]   ;;  %v4499_v60 = vld [vmem:[#allocation7 + $0x3c8] ss:$16 sps:$4 sm:$0xff]   ;;  %v4504_v56 = vld [vmem:[#allocation7 + $0x3e4] ss:$16 sps:$4 sm:$0xff]  }
 0x217   :  { %2835 = vmatpush1.bf16.msra.mxu0 %v4430_v5  ;;  %2941 = vmatpush1.bf16.msra.mxu1 %v4433_v6  ;;  %v4507_v57 = vld [vmem:[#allocation7 + $0x3ec] ss:$16 sps:$4 sm:$0xff]   ;;  %v4502_v61 = vld [vmem:[#allocation7 + $0x3e0] ss:$16 sps:$4 sm:$0xff]   ;;  %v4505_v62 = vld [vmem:[#allocation7 + $0x3e8] ss:$16 sps:$4 sm:$0xff]  }
 0x218   :  { %2836 = vmatprep.subr.bf16.mxu0 %v4438_v7  ;;  %2942 = vmatprep.subr.bf16.mxu1 %v4441_v8  ;;  %v4508_v63 = vld [vmem:[#allocation8 + $0x40] sm:$0xff]   ;;  %v4512_v3 = vld [vmem:[#allocation8 + $0x48] sm:$0xff]   ;;  %v4516_v7 = vld [vmem:[#allocation8 + $0x50] sm:$0xff]  }
 0x219   :  { %v4509_v58 = vld [vmem:[#allocation8 + $0xc0] sm:$0xff]   ;;  %v4513_v4 = vld [vmem:[#allocation8 + $0xc8] sm:$0xff]   ;;  %v4517_v8 = vld [vmem:[#allocation8 + $0xd0] sm:$0xff]  }
 0x21a   :  { %v4510_v1 = vld [vmem:[#allocation8] sm:$0xff]   ;;  %v4514_v5 = vld [vmem:[#allocation8 + $0x8] sm:$0xff]  }
 0x21b   :  { %2837 = vmatpush1.bf16.msra.mxu0 %v4436_v9  ;;  %2943 = vmatpush1.bf16.msra.mxu1 %v4439_v10  ;;  %v4511_v2 = vld [vmem:[#allocation8 + $0x80] sm:$0xff]   ;;  %v4515_v6 = vld [vmem:[#allocation8 + $0x88] sm:$0xff]   ;;  %v4518_v9 = vld [vmem:[#allocation8 + $0x10] sm:$0xff]  }
 0x21c   :  { %2838 = vmatprep.subr.bf16.mxu0 %v4444_v11  ;;  %2944 = vmatprep.subr.bf16.mxu1 %v4447_v12  ;;  %v4519_v10 = vld [vmem:[#allocation8 + $0x90] sm:$0xff]   ;;  %v4520_v11 = vld [vmem:[#allocation8 + $0x58] sm:$0xff]  }
 0x21d   :  { %v4523_v12 = vld [vmem:[#allocation8 + $0x98] sm:$0xff]  }
 0x21f   :  { %2839 = vmatpush1.bf16.msra.mxu0 %v4442_v13  ;;  %2945 = vmatpush1.bf16.msra.mxu1 %v4445_v14  ;;  %v4524_v13 = vld [vmem:[#allocation8 + $0x60] sm:$0xff]  }
 0x220   :  { %2840 = vmatprep.subr.bf16.mxu0 %v4450_v15  ;;  %2946 = vmatprep.subr.bf16.mxu1 %v4453_v16  ;;  %v4525_v14 = vld [vmem:[#allocation8 + $0xe0] sm:$0xff]  }
 0x221   :  { %v4526_v15 = vld [vmem:[#allocation8 + $0x20] sm:$0xff]  }
 0x222   :  { %v4527_v16 = vld [vmem:[#allocation8 + $0xa0] sm:$0xff]  }
 0x223   :  { %2841 = vmatpush1.bf16.msra.mxu0 %v4448_v17  ;;  %2947 = vmatpush1.bf16.msra.mxu1 %v4451_v18  ;;  %v4528_v17 = vld [vmem:[#allocation8 + $0x68] sm:$0xff]  }
 0x224   :  { %2842 = vmatprep.subr.bf16.mxu0 %v4456_v19  ;;  %2948 = vmatprep.subr.bf16.mxu1 %v4459_v20  ;;  %v4529_v18 = vld [vmem:[#allocation8 + $0xe8] sm:$0xff]   ;;  %v4532_v20 = vld [vmem:[#allocation8 + $0x70] sm:$0xff]  }
 0x225   :  { %v4531_v19 = vld [vmem:[#allocation8 + $0xa8] sm:$0xff]  }
 0x227   :  { %2843 = vmatpush1.bf16.msra.mxu0 %v4454_v22  ;;  %2949 = vmatpush1.bf16.msra.mxu1 %v4457_v23  ;;  %v4533_v22 = vld [vmem:[#allocation8 + $0xf0] sm:$0xff]  }
 0x228   :  { %2844 = vmatprep.subr.bf16.mxu0 %v4462_v24  ;;  %2950 = vmatprep.subr.bf16.mxu1 %v4465_v25  ;;  %v4534_v23 = vld [vmem:[#allocation8 + $0x30] sm:$0xff]   ;;  %v4536_v25 = vld [vmem:[#allocation8 + $0x78] sm:$0xff]  }
 0x229   :  { %v4535_v24 = vld [vmem:[#allocation8 + $0xb0] sm:$0xff]  }
 0x22b   :  { %2845 = vmatpush1.bf16.msra.mxu0 %v4460_v26  ;;  %2951 = vmatpush1.bf16.msra.mxu1 %v4463_v27  ;;  %v4537_v26 = vld [vmem:[#allocation8 + $0xf8] sm:$0xff]  }
 0x22c   :  { %2846 = vmatprep.subr.bf16.mxu0 %v4468_v28  ;;  %2952 = vmatprep.subr.bf16.mxu1 %v4471_v29  ;;  %v4538_v27 = vld [vmem:[#allocation8 + $0x38] sm:$0xff]   ;;  %v2113_v29 = vld [vmem:[%s4832_s4] sm:$0xf] }
 0x22d   :  { %v4539_v28 = vld [vmem:[#allocation8 + $0xb8] sm:$0xff]  }
 0x22f   :  { %2847 = vmatpush1.bf16.msra.mxu0 %v4466_v30  ;;  %2953 = vmatpush1.bf16.msra.mxu1 %v4469_v31  ;;  %v2118_v30 = vrot.slane %v2113_v29, %v327_v51  ;;  %v2126_v31 = vrot.slane %v2113_v29, %v335_v52 }
 0x230   :  { %2848 = vmatprep.subr.bf16.mxu0 %v4474_v32  ;;  %2954 = vmatprep.subr.bf16.mxu1 %v4477_v33  ;;  %v2122_v32 = vrot.slane %v2113_v29, %v331_v54  ;;  %v2130_v33 = vrot.slane %v2113_v29, %v339_v55 }
 0x233   :  { %2849 = vmatpush1.bf16.msra.mxu0 %v4472_v34  ;;  %2955 = vmatpush1.bf16.msra.mxu1 %v4475_v35 }
 0x234   :  { %2850 = vmatprep.subr.bf16.mxu0 %v4480_v36  ;;  %2956 = vmatprep.subr.bf16.mxu1 %v4483_v37 }
 0x237   :  { %2851 = vmatpush1.bf16.msra.mxu0 %v4478_v38  ;;  %2957 = vmatpush1.bf16.msra.mxu1 %v4481_v39 }
 0x238   :  { %2852 = vmatprep.subr.bf16.mxu0 %v4486_v40  ;;  %2958 = vmatprep.subr.bf16.mxu1 %v4489_v41 }
 0x23b   :  { %2853 = vmatpush1.bf16.msra.mxu0 %v4484_v42  ;;  %2959 = vmatpush1.bf16.msra.mxu1 %v4487_v43 }
 0x23c   :  { %2854 = vmatprep.subr.bf16.mxu0 %v4492_v44  ;;  %2960 = vmatprep.subr.bf16.mxu1 %v4495_v45 }
 0x23f   :  { %2855 = vmatpush1.bf16.msra.mxu0 %v4490_v46  ;;  %2961 = vmatpush1.bf16.msra.mxu1 %v4493_v47 }
 0x240   :  { %2856 = vmatprep.subr.bf16.mxu0 %v4498_v48  ;;  %2962 = vmatprep.subr.bf16.mxu1 %v4501_v49 }
 0x243   :  { %2857 = vmatpush1.bf16.msra.mxu0 %v4496_v53  ;;  %2963 = vmatpush1.bf16.msra.mxu1 %v4499_v60 }
 0x244   :  { %2858 = vmatprep.subr.bf16.mxu0 %v4504_v56  ;;  %2964 = vmatprep.subr.bf16.mxu1 %v4507_v57 }
 0x247   :  { %2859 = vmatpush1.bf16.msra.mxu0 %v4502_v61  ;;  %2965 = vmatpush1.bf16.msra.mxu1 %v4505_v62 }
 0x248   :  { %3794 = vmatprep.subr.bf16.mxu0 %v4508_v63  ;;  %3822 = vmatprep.subr.bf16.mxu1 %v4509_v58 }
 0x24a   :  { %2861 = vmatmul.mubr.bf16.vlgmr.msra.gmra.mrb[8].mxu0 %v4790_v21  ;;  %2967 = vmatmul.mubr.bf16.vlgmr.msra.gmra.mrb[8].mxu1 %v4790_v21  ;;  %v4521_v21 = vld [vmem:[#allocation8 + $0xd8] sm:$0xff]  }
 0x24b   :  { %2870 = vmatprep.mubr.bf16.mxu0 %v4794_v59  ;;  %2976 = vmatprep.mubr.bf16.mxu1 %v4794_v59  ;;  %v4522_v59 = vld [vmem:[#allocation8 + $0x18] sm:$0xff]  }
 0x24c   :  { %3795 = vmatpush3.bf16.msra.mxu0 %v4510_v1  ;;  %3823 = vmatpush3.bf16.msra.mxu1 %v4511_v2 }
 0x24d   :  { %3796 = vmatprep.subr.bf16.mxu0 %v4512_v3  ;;  %3824 = vmatprep.subr.bf16.mxu1 %v4513_v4 }
 0x250   :  { %3797 = vmatpush3.bf16.msra.mxu0 %v4514_v5  ;;  %3825 = vmatpush3.bf16.msra.mxu1 %v4515_v6 }
 0x251   :  { %3798 = vmatprep.subr.bf16.mxu0 %v4516_v7  ;;  %3826 = vmatprep.subr.bf16.mxu1 %v4517_v8 }
 0x252   :  { %2871 = vmatmul.mubr.bf16.gmra.mrb[12].mxu0 %v4792_v0  ;;  %2977 = vmatmul.mubr.bf16.gmra.mrb[12].mxu1 %v4792_v0  ;;  %v4530_v0 = vld [vmem:[#allocation8 + $0x28] sm:$0xff]  }
 0x254   :  { %3799 = vmatpush3.bf16.msra.mxu0 %v4518_v9  ;;  %3827 = vmatpush3.bf16.msra.mxu1 %v4519_v10 }
 0x255   :  { %3800 = vmatprep.subr.bf16.mxu0 %v4520_v11  ;;  %3828 = vmatprep.subr.bf16.mxu1 %v4521_v21 }
 0x258   :  { %3801 = vmatpush3.bf16.msra.mxu0 %v4522_v59  ;;  %3829 = vmatpush3.bf16.msra.mxu1 %v4523_v12 }
 0x259   :  { %3802 = vmatprep.subr.bf16.mxu0 %v4524_v13  ;;  %3830 = vmatprep.subr.bf16.mxu1 %v4525_v14 }
 0x25c   :  { %3803 = vmatpush3.bf16.msra.mxu0 %v4526_v15  ;;  %3831 = vmatpush3.bf16.msra.mxu1 %v4527_v16 }
 0x25d   :  { %3804 = vmatprep.subr.bf16.mxu0 %v4528_v17  ;;  %3832 = vmatprep.subr.bf16.mxu1 %v4529_v18 }
 0x260   :  { %3805 = vmatpush3.bf16.msra.mxu0 %v4530_v0  ;;  %3833 = vmatpush3.bf16.msra.mxu1 %v4531_v19 }
 0x261   :  { %3806 = vmatprep.subr.bf16.mxu0 %v4532_v20  ;;  %3834 = vmatprep.subr.bf16.mxu1 %v4533_v22 }
 0x264   :  { %3807 = vmatpush3.bf16.msra.mxu0 %v4534_v23  ;;  %3835 = vmatpush3.bf16.msra.mxu1 %v4535_v24 }
 0x265   :  { %3808 = vmatprep.subr.bf16.mxu0 %v4536_v25  ;;  %3836 = vmatprep.subr.bf16.mxu1 %v4537_v26 }
 0x268   :  { %3809 = vmatpush3.bf16.msra.mxu0 %v4538_v27  ;;  %3837 = vmatpush3.bf16.msra.mxu1 %v4539_v28  ;;  %v3761_v28 = vld [vmem:[%s4834_s6] ss:$0 sm:$0xff]  ;;  %s4669_s6 = smov [#allocation10]  }
 0x269   :  { %s3381_s8 = sshll.u32 %s4669_s6, 4  ;;  %s3382_s8 = int_to_ptr.vmem [resolvable:$true] %s3381_s8 }
 0x26a   :  { %s4628_s9 = scalar_lea.vmem %s3382_s8, 512  ;;  %p4633_p5 = scmp.lt.s32.totalorder %s3382_s8, %s3382_s8 }
 0x26b   :  { %p4629_p4 = scmp.ne.s32.totalorder %s3382_s8, %s4628_s9  ;;  %p4634_p6 = scmp.lt.s32.totalorder %s4628_s9, %s4628_s9 }
 0x26d   :  { %p4635_p7 = por %p4634_p6, %p4633_p5 }
 0x26f   :  { %p4636_p8 = pnand %p4635_p7, %p4629_p4 }
 0x31d   :  { %v2862_v34 = vpop.f32.mrb[8].mxu0  ;;  %v2968_v35 = vpop.f32.mrb[8].mxu1 }
 0x31e   :  { %v3866_v36 = vadd.f32 %v2862_v34, %v2118_v30  ;;  %v3874_v37 = vadd.f32 %v2968_v35, %v2126_v31  ;;  %v2864_v38 = vpop.f32.mrb[9].mxu0  ;;  %v2970_v39 = vpop.f32.mrb[9].mxu1 }
 0x31f   :  { %v3867_v40 = vadd.f32 %v2864_v38, %v2122_v32  ;;  %v3875_v41 = vadd.f32 %v2970_v39, %v2130_v33  ;;  %v2866_v42 = vpop.f32.mrb[10].mxu0  ;;  %v2972_v43 = vpop.f32.mrb[10].mxu1 }
 0x320   :  { %v3868_v51 = vadd.f32 %v2866_v42, %v2118_v30  ;;  %v3876_v44 = vadd.f32 %v2972_v43, %v2126_v31  ;;  %v2868_v45 = vpop.f32.mrb[11].mxu0  ;;  %v2974_v52 = vpop.f32.mrb[11].mxu1  ;;  %v2987_v54 = vmax.f32 %v3866_v36, 0.0  ;;  %v2989_v48 = vmax.f32 %v3874_v37, 0.0 }
 0x321   :  { %v3869_v46 = vadd.f32 %v2868_v45, %v2122_v32  ;;  %v3877_v47 = vadd.f32 %v2974_v52, %v2130_v33  ;;  %v2988_v49 = vmax.f32 %v3867_v40, 0.0  ;;  %v2990_v53 = vmax.f32 %v3875_v41, 0.0 }
 0x322   :  { %v2991_v50 = vmax.f32 %v3868_v51, 0.0  ;;  %v2993_v55 = vmax.f32 %v3876_v44, 0.0 }
 0x323   :  { %v2992_v60 = vmax.f32 %v3869_v46, 0.0  ;;  %v2994_v56 = vmax.f32 %v3877_v47, 0.0 }
 0x324   :  { %v3003_v57 = vpack.c.bf16 %v2991_v50, %v2987_v54  ;;  %v3005_v61 = vpack.c.bf16 %v2993_v55, %v2989_v48 }
 0x325   :  { %v3004_v62 = vpack.c.bf16 %v2992_v60, %v2988_v49  ;;  %v3006_v63 = vpack.c.bf16 %v2994_v56, %v2990_v53  ;;  %v2872_v58 = vpop.f32.mrb[12].mxu0  ;;  %v2978_v1 = vpop.f32.mrb[12].mxu1 }
 0x326   :  { %v3870_v2 = vadd.f32 %v2872_v58, %v2118_v30  ;;  %v3878_v3 = vadd.f32 %v2978_v1, %v2126_v31  ;;  %v2874_v4 = vpop.f32.mrb[13].mxu0  ;;  %v2980_v5 = vpop.f32.mrb[13].mxu1 }
 0x327   :  { %v3871_v6 = vadd.f32 %v2874_v4, %v2122_v32  ;;  %v3879_v7 = vadd.f32 %v2980_v5, %v2130_v33  ;;  %v2876_v8 = vpop.f32.mrb[14].mxu0  ;;  %v2982_v9 = vpop.f32.mrb[14].mxu1  ;;  %3306 = vmatprep.mubr.bf16.mxu0 %v3004_v62  ;;  %3355 = vmatprep.mubr.bf16.mxu1 %v3006_v63 }
 0x328   :  { %v3872_v10 = vadd.f32 %v2876_v8, %v2118_v30  ;;  %v3880_v11 = vadd.f32 %v2982_v9, %v2126_v31  ;;  %v2878_v21 = vpop.f32.mrb[15].mxu0  ;;  %v2984_v59 = vpop.f32.mrb[15].mxu1  ;;  %3307 = vmatmul.mubr.bf16.vlgmr.msra.gmra.mrb[16].mxu0 %v3003_v57  ;;  %3356 = vmatmul.mubr.bf16.vlgmr.msra.gmra.mrb[16].mxu1 %v3005_v61  ;;  %v2995_v14 = vmax.f32 %v3870_v2, 0.0  ;;  %v2997_v15 = vmax.f32 %v3878_v3, 0.0 }
 0x329   :  { %v3873_v12 = vadd.f32 %v2878_v21, %v2122_v32  ;;  %v3881_v13 = vadd.f32 %v2984_v59, %v2130_v33  ;;  %v2996_v18 = vmax.f32 %v3871_v6, 0.0  ;;  %v2998_v0 = vmax.f32 %v3879_v7, 0.0 }
 0x32a   :  { %v2999_v16 = vmax.f32 %v3872_v10, 0.0  ;;  %v3001_v17 = vmax.f32 %v3880_v11, 0.0 }
 0x32b   :  { %v3000_v19 = vmax.f32 %v3873_v12, 0.0  ;;  %v3002_v20 = vmax.f32 %v3881_v13, 0.0 }
 0x32c   :  { %v3007_v22 = vpack.c.bf16 %v2999_v16, %v2995_v14  ;;  %v3009_v23 = vpack.c.bf16 %v3001_v17, %v2997_v15 }
 0x32d   :  { %v3008_v24 = vpack.c.bf16 %v3000_v19, %v2996_v18  ;;  %v3010_v25 = vpack.c.bf16 %v3002_v20, %v2998_v0 }
 0x32f   :  { %3314 = vmatprep.mubr.bf16.mxu0 %v3008_v24  ;;  %3363 = vmatprep.mubr.bf16.mxu1 %v3010_v25 }
 0x330   :  { %3315 = vmatmul.mubr.bf16.gmra.mrb[20].mxu0 %v3007_v22  ;;  %3364 = vmatmul.mubr.bf16.gmra.mrb[20].mxu1 %v3009_v23 }
 0x3fb   :  { %v3810_v26 = vpop.f32.mrb[16].mxu0  ;;  %v3838_v27 = vpop.f32.mrb[16].mxu1 }
 0x3fc   :  { %v3811_v29 = vpop.f32.mrb[17].mxu0  ;;  %v3839_v30 = vpop.f32.mrb[17].mxu1 }
 0x3fd   :  { %v3812_v31 = vadd.f32 %v3811_v29, %v3810_v26  ;;  %v3840_v32 = vadd.f32 %v3839_v30, %v3838_v27  ;;  %v3813_v33 = vpop.f32.mrb[18].mxu0  ;;  %v3841_v34 = vpop.f32.mrb[18].mxu1 }
 0x3fe   :  { %v3814_v35 = vpop.f32.mrb[19].mxu0  ;;  %v3842_v36 = vpop.f32.mrb[19].mxu1 }
 0x3ff   :  { %v3309_v37 = vadd.f32 %v3812_v31, %v3761_v28  ;;  %v3815_v38 = vadd.f32 %v3814_v35, %v3813_v33  ;;  %v3843_v39 = vadd.f32 %v3842_v36, %v3841_v34 }
 0x401   :  { %v3358_v40 = vadd.f32 %v3840_v32, %v3309_v37  ;;  %v3312_v41 = vadd.f32 %v3815_v38, %v3761_v28 }
 0x403   :  { %3372 = vst [vmem:[#allocation10] sm:$0xff] %v3358_v40  ;;  %v3361_v42 = vadd.f32 %v3843_v39, %v3312_v41  ;;  %v3816_v43 = vpop.f32.mrb[20].mxu0  ;;  %v3844_v51 = vpop.f32.mrb[20].mxu1 }
 0x404   :  { %v3817_v44 = vpop.f32.mrb[21].mxu0  ;;  %v3845_v45 = vpop.f32.mrb[21].mxu1 }
 0x405   :  { %3373 = vst [vmem:[#allocation10 + $0x8] sm:$0xff] %v3361_v42  ;;  %v3818_v52 = vadd.f32 %v3817_v44, %v3816_v43  ;;  %v3846_v46 = vadd.f32 %v3845_v45, %v3844_v51  ;;  %v3819_v47 = vpop.f32.mrb[22].mxu0  ;;  %v3847_v54 = vpop.f32.mrb[22].mxu1 }
 0x406   :  { %v3820_v48 = vpop.f32.mrb[23].mxu0  ;;  %v3848_v50 = vpop.f32.mrb[23].mxu1 }
 0x407   :  { %v3317_v55 = vadd.f32 %v3818_v52, %v3761_v28  ;;  %v3821_v49 = vadd.f32 %v3820_v48, %v3819_v47  ;;  %v3849_v53 = vadd.f32 %v3848_v50, %v3847_v54 }
 0x409   :  { %v3366_v60 = vadd.f32 %v3846_v46, %v3317_v55  ;;  %v3320_v56 = vadd.f32 %v3821_v49, %v3761_v28 }
 0x40b   :  { %3374 = vst [vmem:[#allocation10 + $0x10] sm:$0xff] %v3366_v60  ;;  %v3369_v57 = vadd.f32 %v3849_v53, %v3320_v56 }
 0x40d   :  { %3375 = vst [vmem:[#allocation10 + $0x18] sm:$0xff] %v3369_v57 }
 0x40e   :  { %4639 = shalt.err (!%p4636_p8)
}
 0x40f   :  { %s4640_s14 = scalar_lea.hbm %s4835_s7, 512 }
 0x410   :  { %p4641_p9 = scmp.ne.s32.totalorder %s4835_s7, %s4640_s14  ;;  %p4644_p10 = scmp.lt.u32.totalorder %s4640_s14, %s4835_s7 }
 0x412   :  { %p4646_p11 = pnand %p4644_p10, %p4641_p9 }
 0x414   :  { %4649 = shalt.err (!%p4646_p11)
}
 0x415   :  { %s4670_s16 = smov 128   ;;  %s4671_s19 = smov 8  }
 0x416   :  { %3387 = dma.vmem_to_hbm [thread:$0]  %s3382_s8, 512, %s4835_s7, [#allocation4], %s4670_s16, %s4670_s16, %s4671_s19  }
 0x417   :  { %4656 = dma.done.wait [#allocation4], 512  }
 0x418   :  { %4657 = vsyncadd [#allocation4], 4294966784 }
 0x419   :  { %3391 = vsyncpa [#allocation3], 1 }
 0x41a   :  { %3392 = vsyncpa [#allocation6], 1 }
 0x41b   :  { %3393 = vsyncpa [#allocation9], 1 }
 0x41c   :  { %3394 = vsyncpa [#allocation4], 1 }

</bundles_post_ra>
